<compile_context>
chip_gen: v7x
topology: tpu7x:2x2x1
jax: 0.10.0
libtpu: 0.0.40
codegen_flags: <defaults>
</compile_context>

<pallas_src>
import jax
import jax.numpy as jnp
from jax.experimental import pallas as pl
from jax.experimental.pallas import tpu as pltpu


def _make_conv_prelu_kernel(h, w, cin, k, kkc, kkc_pad):
    """Builds the fused conv(3x3, SAME) + bias + PReLU kernel for one image."""
    hw = h * w

    def kernel(x_ref, w_ref, b_ref, a_ref, o_ref):
        # x_ref: (H+2p, W+2p, Cin)   zero-padded NHWC image (VMEM)
        # w_ref: (KKC_PAD, COUT_PAD) flattened conv weights, zero-padded (VMEM)
        # b_ref: (1, COUT_PAD)       bias, zero-padded (VMEM)
        # a_ref: (1,)                PReLU shared alpha (SMEM scalar)
        # o_ref: (HW, COUT_PAD)      lane-dense conv+PReLU output slab (VMEM)

        # ---- in-kernel im2col: 9 shifted slices, tap order [kh, kw, cin] ----
        taps = []
        for kh in range(k):
            for kw in range(k):
                tap = x_ref[kh:kh + h, kw:kw + w, :]        # (H, W, Cin)
                taps.append(tap.reshape(hw, cin))           # leading-dim merge (no-op layout)
        if kkc_pad > kkc:
            taps.append(jnp.zeros((hw, kkc_pad - kkc), dtype=taps[0].dtype))
        patches = jnp.concatenate(taps, axis=-1)            # (HW, KKC_PAD), lane dense

        # ---- single MXU matmul, f32 accumulation, fused bias + PReLU ----
        y = jnp.dot(patches, w_ref[...],
                    preferred_element_type=jnp.float32)     # (HW, COUT_PAD)
        y = y + b_ref[...]                                  # (1, COUT_PAD) broadcast
        alpha = a_ref[0]                                     # SMEM scalar read
        y = jnp.where(y >= 0.0, y, alpha * y)               # PReLU (shared alpha)

        o_ref[...] = y.astype(o_ref.dtype)                  # unmasked 128-lane stores

    return kernel


def subpixel_conv_block(x_nchw, w_oihw, bias, alpha, *, scale=2,
                        compute_dtype=jnp.float32):
    """Forward pass matching PyTorch SubPixelConvolutionalBlock.

    x_nchw: (N, Cin, H, W) -> returns (N, Cin, H*scale, W*scale)
    """
    n, cin, h, w = x_nchw.shape
    cout, cin_w, k, k2 = w_oihw.shape
    assert cin_w == cin and k == k2 and cout == cin * scale * scale
    pad = k // 2
    hp, wp = h + 2 * pad, w + 2 * pad
    hw = h * w
    kkc = k * k * cin
    kkc_pad = ((kkc + 127) // 128) * 128      # MXU K dim padded to 128
    cout_pad = ((cout + 127) // 128) * 128    # lane-dense output width
    assert hw % 8 == 0, "H*W must be a multiple of 8 for (8,128) tiling"
    out_dtype = x_nchw.dtype

    # ---- prologue glue (XLA): one NCHW->NHWC transpose + spatial zero pad ----
    x_nhwc = jnp.transpose(x_nchw, (0, 2, 3, 1)).astype(compute_dtype)
    x_pad = jnp.pad(x_nhwc, ((0, 0), (pad, pad), (pad, pad), (0, 0)))

    # ---- parameters flattened / zero-padded to MXU-friendly shapes ----
    # weight rows ordered [kh, kw, cin] to match the in-kernel patch columns
    w_mat = jnp.transpose(w_oihw, (2, 3, 1, 0)).reshape(kkc, cout)
    w_mat = jnp.pad(w_mat, ((0, kkc_pad - kkc), (0, cout_pad - cout))).astype(compute_dtype)
    b_mat = jnp.pad(bias.astype(jnp.float32), (0, cout_pad - cout)).reshape(1, cout_pad)
    a_vec = jnp.asarray(alpha, jnp.float32).reshape((1,))

    kernel = _make_conv_prelu_kernel(h, w, cin, k, kkc, kkc_pad)

    slab = pl.pallas_call(
        kernel,
        out_shape=jax.ShapeDtypeStruct((n, hw, cout_pad), out_dtype),
        grid=(n,),
        in_specs=[
            pl.BlockSpec((None, hp, wp, cin), lambda i: (i, 0, 0, 0)),   # padded NHWC image
            pl.BlockSpec((kkc_pad, cout_pad), lambda i: (0, 0)),         # weights (resident)
            pl.BlockSpec((1, cout_pad), lambda i: (0, 0)),               # bias (resident)
            pl.BlockSpec(memory_space=pltpu.MemorySpace.SMEM),           # PReLU alpha scalar
        ],
        out_specs=pl.BlockSpec((None, hw, cout_pad), lambda i: (i, 0, 0)),
        compiler_params=pltpu.CompilerParams(dimension_semantics=("parallel",)),
    )(x_pad, w_mat, b_mat, a_vec)

    # ---- epilogue glue (XLA): pixel shuffle + NHWC->NCHW in ONE 6-D transpose ----
    r = scale
    c_final = cout // (r * r)                           # == cin
    y = slab[:, :, :cout].reshape(n, h, w, c_final, r, r)
    y = jnp.transpose(y, (0, 3, 1, 4, 2, 5))            # (N, C, H, r, W, r)
    return y.reshape(n, c_final, h * r, w * r)          # (N, Cin, H*r, W*r)


# --------------------------- reference (pure JAX) ---------------------------

def _pixel_shuffle_nchw(y, r):
    n, crr, h, w = y.shape
    c = crr // (r * r)
    y = y.reshape(n, c, r, r, h, w)
    y = jnp.transpose(y, (0, 1, 4, 2, 5, 3))
    return y.reshape(n, c, h * r, w * r)


def _reference(x_nchw, w_oihw, bias, alpha, scale):
    y = jax.lax.conv_general_dilated(
        x_nchw, w_oihw, window_strides=(1, 1), padding="SAME",
        dimension_numbers=("NCHW", "OIHW", "NCHW"))
    y = y + bias[None, :, None, None]
    y = _pixel_shuffle_nchw(y, scale)
    return jnp.where(y >= 0, y, alpha * y)


if __name__ == "__main__":
    key = jax.random.PRNGKey(0)
    kx, kw, kb = jax.random.split(key, 3)

    N, H, W = 2, 16, 16
    CIN = 8              # small n_channels, consistent with the module (default 64)
    SCALE = 2            # class default scaling_factor=2
    K = 3
    COUT = CIN * SCALE * SCALE

    x = jax.random.normal(kx, (N, CIN, H, W), dtype=jnp.float32)

    # Deterministic init matching nn.Conv2d(8, 32, 3, padding=1) + nn.PReLU() shapes.
    fan_in = CIN * K * K
    bound = 1.0 / (fan_in ** 0.5)
    w_conv = jax.random.uniform(kw, (COUT, CIN, K, K), dtype=jnp.float32,
                                minval=-bound, maxval=bound)
    b_conv = jax.random.uniform(kb, (COUT,), dtype=jnp.float32,
                                minval=-bound, maxval=bound)
    alpha = jnp.float32(0.25)  # nn.PReLU() default

    out = subpixel_conv_block(x, w_conv, b_conv, alpha, scale=SCALE)
    out = jax.block_until_ready(out)

    ref = _reference(x, w_conv, b_conv, alpha, SCALE)
    assert out.shape == (N, CIN, H * SCALE, W * SCALE), out.shape
    assert jnp.allclose(out, ref, atol=1e-4, rtol=1e-4), "mismatch vs reference"

    print("KERNEL_OK")
</pallas_src>

<mosaic_0001>
module attributes {stable_mosaic.version = 11 : i64} {
  func.func @kernel(%arg0: i32, %arg1: memref<1x18x18x8xf32, #tpu.memory_space<vmem>>, %arg2: memref<128x128xf32, #tpu.memory_space<vmem>>, %arg3: memref<1x128xf32, #tpu.memory_space<vmem>>, %arg4: memref<1xf32, #tpu.memory_space<smem>>, %arg5: memref<1x256x128xf32, #tpu.memory_space<vmem>>) attributes {dimension_semantics = [#tpu.dimension_semantics<parallel>], iteration_bounds = array<i64: 2>, scalar_prefetch = 0 : i64, scratch_operands = 0 : i64, tpu.core_type = #tpu.core_type<tc>, window_params = [{transform_indices = @transform_0, window_bounds = array<i64: 1, 18, 18, 8>}, {pipeline_mode = #tpu.pipeline_mode<synchronous>, transform_indices = @transform_1, window_bounds = array<i64: 128, 128>}, {pipeline_mode = #tpu.pipeline_mode<synchronous>, transform_indices = @transform_2, window_bounds = array<i64: 1, 128>}, {transform_indices = @transform_3, window_bounds = array<i64: 1>}, {transform_indices = @transform_4, window_bounds = array<i64: 1, 256, 128>}]} {
    %c0 = arith.constant 0 : index
    %c0_0 = arith.constant 0 : index
    %c0_1 = arith.constant 0 : index
    %c0_2 = arith.constant 0 : index
    %0 = vector.load %arg1[%c0, %c0_0, %c0_1, %c0_2] : memref<1x18x18x8xf32, #tpu.memory_space<vmem>>, vector<1x16x16x8xf32>
    %1 = vector.shape_cast %0 : vector<1x16x16x8xf32> to vector<16x16x8xf32>
    %2 = vector.shape_cast %1 : vector<16x16x8xf32> to vector<256x8xf32>
    %c0_3 = arith.constant 0 : index
    %c0_4 = arith.constant 0 : index
    %c1 = arith.constant 1 : index
    %c0_5 = arith.constant 0 : index
    %3 = vector.load %arg1[%c0_3, %c0_4, %c1, %c0_5] : memref<1x18x18x8xf32, #tpu.memory_space<vmem>>, vector<1x16x16x8xf32>
    %4 = vector.shape_cast %3 : vector<1x16x16x8xf32> to vector<16x16x8xf32>
    %5 = vector.shape_cast %4 : vector<16x16x8xf32> to vector<256x8xf32>
    %c0_6 = arith.constant 0 : index
    %c0_7 = arith.constant 0 : index
    %c2 = arith.constant 2 : index
    %c0_8 = arith.constant 0 : index
    %6 = vector.load %arg1[%c0_6, %c0_7, %c2, %c0_8] : memref<1x18x18x8xf32, #tpu.memory_space<vmem>>, vector<1x16x16x8xf32>
    %7 = vector.shape_cast %6 : vector<1x16x16x8xf32> to vector<16x16x8xf32>
    %8 = vector.shape_cast %7 : vector<16x16x8xf32> to vector<256x8xf32>
    %c0_9 = arith.constant 0 : index
    %c1_10 = arith.constant 1 : index
    %c0_11 = arith.constant 0 : index
    %c0_12 = arith.constant 0 : index
    %9 = vector.load %arg1[%c0_9, %c1_10, %c0_11, %c0_12] : memref<1x18x18x8xf32, #tpu.memory_space<vmem>>, vector<1x16x16x8xf32>
    %10 = vector.shape_cast %9 : vector<1x16x16x8xf32> to vector<16x16x8xf32>
    %11 = vector.shape_cast %10 : vector<16x16x8xf32> to vector<256x8xf32>
    %c0_13 = arith.constant 0 : index
    %c1_14 = arith.constant 1 : index
    %c1_15 = arith.constant 1 : index
    %c0_16 = arith.constant 0 : index
    %12 = vector.load %arg1[%c0_13, %c1_14, %c1_15, %c0_16] : memref<1x18x18x8xf32, #tpu.memory_space<vmem>>, vector<1x16x16x8xf32>
    %13 = vector.shape_cast %12 : vector<1x16x16x8xf32> to vector<16x16x8xf32>
    %14 = vector.shape_cast %13 : vector<16x16x8xf32> to vector<256x8xf32>
    %c0_17 = arith.constant 0 : index
    %c1_18 = arith.constant 1 : index
    %c2_19 = arith.constant 2 : index
    %c0_20 = arith.constant 0 : index
    %15 = vector.load %arg1[%c0_17, %c1_18, %c2_19, %c0_20] : memref<1x18x18x8xf32, #tpu.memory_space<vmem>>, vector<1x16x16x8xf32>
    %16 = vector.shape_cast %15 : vector<1x16x16x8xf32> to vector<16x16x8xf32>
    %17 = vector.shape_cast %16 : vector<16x16x8xf32> to vector<256x8xf32>
    %c0_21 = arith.constant 0 : index
    %c2_22 = arith.constant 2 : index
    %c0_23 = arith.constant 0 : index
    %c0_24 = arith.constant 0 : index
    %18 = vector.load %arg1[%c0_21, %c2_22, %c0_23, %c0_24] : memref<1x18x18x8xf32, #tpu.memory_space<vmem>>, vector<1x16x16x8xf32>
    %19 = vector.shape_cast %18 : vector<1x16x16x8xf32> to vector<16x16x8xf32>
    %20 = vector.shape_cast %19 : vector<16x16x8xf32> to vector<256x8xf32>
    %c0_25 = arith.constant 0 : index
    %c2_26 = arith.constant 2 : index
    %c1_27 = arith.constant 1 : index
    %c0_28 = arith.constant 0 : index
    %21 = vector.load %arg1[%c0_25, %c2_26, %c1_27, %c0_28] : memref<1x18x18x8xf32, #tpu.memory_space<vmem>>, vector<1x16x16x8xf32>
    %22 = vector.shape_cast %21 : vector<1x16x16x8xf32> to vector<16x16x8xf32>
    %23 = vector.shape_cast %22 : vector<16x16x8xf32> to vector<256x8xf32>
    %c0_29 = arith.constant 0 : index
    %c2_30 = arith.constant 2 : index
    %c2_31 = arith.constant 2 : index
    %c0_32 = arith.constant 0 : index
    %24 = vector.load %arg1[%c0_29, %c2_30, %c2_31, %c0_32] : memref<1x18x18x8xf32, #tpu.memory_space<vmem>>, vector<1x16x16x8xf32>
    %25 = vector.shape_cast %24 : vector<1x16x16x8xf32> to vector<16x16x8xf32>
    %26 = vector.shape_cast %25 : vector<16x16x8xf32> to vector<256x8xf32>
    %cst = arith.constant 0.000000e+00 : f32
    %27 = vector.broadcast %cst : f32 to vector<256x56xf32>
    %28 = tpu.concatenate %2, %5, %8, %11, %14, %17, %20, %23, %26, %27 in 1 : vector<256x8xf32>, vector<256x8xf32>, vector<256x8xf32>, vector<256x8xf32>, vector<256x8xf32>, vector<256x8xf32>, vector<256x8xf32>, vector<256x8xf32>, vector<256x8xf32>, vector<256x56xf32> -> vector<256x128xf32>
    %c0_33 = arith.constant 0 : index
    %c0_34 = arith.constant 0 : index
    %29 = vector.load %arg2[%c0_33, %c0_34] : memref<128x128xf32, #tpu.memory_space<vmem>>, vector<128x128xf32>
    %cst_35 = arith.constant dense<0.000000e+00> : vector<256x128xf32>
    %30 = tpu.matmul %28, %29, %cst_35 {dimension_numbers = #tpu.dot_dimension_numbers<[1], [0], [0], [1], [0, 0, 1, 1], [], []>} : vector<256x128xf32>, vector<128x128xf32>, vector<256x128xf32> -> vector<256x128xf32>
    %c0_36 = arith.constant 0 : index
    %c0_37 = arith.constant 0 : index
    %31 = vector.load %arg3[%c0_36, %c0_37] : memref<1x128xf32, #tpu.memory_space<vmem>>, vector<1x128xf32>
    %32 = vector.broadcast %31 : vector<1x128xf32> to vector<256x128xf32>
    %33 = arith.addf %30, %32 : vector<256x128xf32>
    %c0_38 = arith.constant 0 : index
    %34 = memref.load %arg4[%c0_38] : memref<1xf32, #tpu.memory_space<smem>>
    %cst_39 = arith.constant 0.000000e+00 : f32
    %35 = vector.broadcast %cst_39 : f32 to vector<256x128xf32>
    %36 = arith.cmpf oge, %33, %35 : vector<256x128xf32>
    %37 = vector.broadcast %34 : f32 to vector<256x128xf32>
    %38 = arith.mulf %37, %33 : vector<256x128xf32>
    %39 = arith.select %36, %33, %38 : vector<256x128xi1>, vector<256x128xf32>
    %c0_40 = arith.constant 0 : index
    %c0_41 = arith.constant 0 : index
    %c0_42 = arith.constant 0 : index
    %40 = vector.load %arg5[%c0_40, %c0_41, %c0_42] : memref<1x256x128xf32, #tpu.memory_space<vmem>>, vector<1x256x128xf32>
    %41 = vector.shape_cast %40 : vector<1x256x128xf32> to vector<256x128xf32>
    %42 = vector.shape_cast %39 : vector<256x128xf32> to vector<1x256x128xf32>
    tpu.vector_store %arg5[%c0_40, %c0_41, %c0_42], %42 {strides = array<i32>} : memref<1x256x128xf32, #tpu.memory_space<vmem>>, vector<1x256x128xf32>,
    return
  }
  func.func @transform_0(%arg0: i32) -> (i32, i32, i32, i32) {
    %c0_i32 = arith.constant 0 : i32
    %c0_i32_0 = arith.constant 0 : i32
    %c0_i32_1 = arith.constant 0 : i32
    %c0_i32_2 = arith.constant 0 : i32
    return %arg0, %c0_i32, %c0_i32_0, %c0_i32_1 : i32, i32, i32, i32
  }
  func.func @transform_1(%arg0: i32) -> (i32, i32) {
    %c0_i32 = arith.constant 0 : i32
    %c0_i32_0 = arith.constant 0 : i32
    %c0_i32_1 = arith.constant 0 : i32
    return %c0_i32, %c0_i32_0 : i32, i32
  }
  func.func @transform_2(%arg0: i32) -> (i32, i32) {
    %c0_i32 = arith.constant 0 : i32
    %c0_i32_0 = arith.constant 0 : i32
    %c0_i32_1 = arith.constant 0 : i32
    return %c0_i32, %c0_i32_0 : i32, i32
  }
  func.func @transform_3(%arg0: i32) -> i32 {
    %c0_i32 = arith.constant 0 : i32
    %c0_i32_0 = arith.constant 0 : i32
    return %c0_i32 : i32
  }
  func.func @transform_4(%arg0: i32) -> (i32, i32, i32) {
    %c0_i32 = arith.constant 0 : i32
    %c0_i32_0 = arith.constant 0 : i32
    %c0_i32_1 = arith.constant 0 : i32
    return %arg0, %c0_i32, %c0_i32_0 : i32, i32, i32
  }
}

</mosaic_0001>

<bundles_post_ra>
// kernel: tpu_custom_call.1
= control target key start
LH: loop header
LB: loop body
LE: loop exit
PB: predicated region body
PF: predicated region fallthrough
CT: control target
= control target key end

     0   :  { %s4447_s0 = inlined_call_operand.vmem [shape: f32[2,18,18,8], index: 0, kind: input, shape index: {}]   ;;  %s4448_s1 = inlined_call_operand.vmem [shape: f32[128,128], index: 1, kind: input, shape index: {}]   ;;  %s4449_s2 = inlined_call_operand.vmem [shape: f32[1,128], index: 2, kind: input, shape index: {}]   ;;  %s4450_s3 = inlined_call_operand.<no memory space> [shape: f32[1], index: 3, kind: input, shape index: {}]   ;;  %s4451_s4 = inlined_call_operand.hbm [shape: f32[2,256,128], index: 4, kind: output, shape index: {}]  }
   0x1   :  { %9 = sst [smem:[#allocation2]] %s4450_s3 }
   0x2   :  { %10 = vsyncpa [#allocation4], 0 }
   0x3   :  { %12 = vsyncpa [#allocation4 + $0x1], 0  ;;  %s2826_s17 = smov 0   ;;  %s2828_s18 = smov 0  }
   0x4   :  { %s2830_s19 = smov 0   ;;  %s2832_s20 = smov 0  }
   0x5 LB: > { %s2847_s3 = sadd.s32 4294967295, %s2786_s20   ;;  %s2262_s21 = sadd.s32 4294967294, %s2786_s20   ;;  %s2786_s20 = sphi %s2832_s20, %s4580_s20   ;;  %s2782_s19 = sphi %s2830_s19, %s4579_s19   ;;  %s2778_s18 = sphi %s2828_s18, %s4578_s18   ;;  %s2774_s17 = sphi %s2826_s17, %s4577_s17  }
   0x6   : > { %s2851_s22 = sadd.s32 1, %s2786_s20   ;;  %s114_s23 = sadd.s32 1, %s2782_s19 }
   0x7   : > { %s111_s24 = ssub.s32 %s2786_s20, %s2851_s22  ;;  %p124_p0 = scmp.ne.s32.totalorder %s2782_s19, %s2778_s18 }
   0x8   : > { %p112_p1 = scmp.eq.s32.totalorder %s111_s24, 0  ;;  %p125_p2 = scmp.eq.s32.totalorder %s2847_s3, 1 }
   0x9   : > { %p130_p3 = scmp.ne.s32.totalorder %s2778_s18, %s2774_s17  ;;  %p131_p4 = scmp.eq.s32.totalorder %s2262_s21, 1 }
   0xa   : > { %s2862_s25 = scalar_select %p112_p1, %s2782_s19, %s114_s23  }
   0xb   : > { %p2864_p5 = por %p125_p2, %p124_p0  ;;  %p2868_p6 = por %p131_p4, %p130_p3 }
   0xc   : > { %p2265_p7 = scmp.ge.s32.totalorder %s2786_s20, 1  ;;  %p166_p8 = scmp.lt.s32.totalorder %s2786_s20, 3 }
   0xe   : > { %p167_p9 = pnand %p2265_p7, %p166_p8 }
  0x10   : > { %170 = sbr.rel (%p167_p9) target bundleno = 888 (0x378), region = 36 }
  0x17   : > { %p192_p10 = scmp.lt.s32.totalorder %s2847_s3, 1  ;;  %s2788_s7 = smov 8   ;;  %vm1511_vm0 = vcmask 64512   ;;  %vm1544_vm1 = vcmask 130048   ;;  %vm1577_vm2 = vcmask 195584   ;;  %vm1610_vm3 = vcmask 261120  }
  0x18   : > { %s2789_s8 = smov 16   ;;  %s2790_s9 = smov 24   ;;  %vm1643_vm4 = vcmask 326656   ;;  %vm1676_vm5 = vcmask 392192   ;;  %vm1709_vm6 = vcmask 457728   ;;  %vm1742_vm7 = vcmask 523264  }
  0x19   : > { %s193_s28 = scalar_select %p192_p10, %s2847_s3, 1  ;;  %vm1775_vm8 = vcmask 588800  }
  0x1a   : > { %s2791_s10 = smov 32   ;;  %s2792_s5 = smov 40  }
  0x1b   : > { %s2675_s29 = smul.u32 432, %s193_s28  ;;  %s2793_s21 = smov 48  }
  0x1c   : > { %s2794_s12 = smov 56   ;;  %s2795_s23 = smov 64  }
  0x1d   : > { %s2879_s6 = scalar_lea.vmem %s4447_s0, %s2675_s29  ;;  %s2498_s29 = sshll.u32 %s2847_s3, 12 }
  0x1e   : > { %v2882_v0 = vld [vmem:[%s2879_s6 + $0x19] sm:$0xff]  ;;  %v229_v1 = vld [vmem:[%s2879_s6 + $0x1] sm:$0xff]  ;;  %v230_v3 = vld [vmem:[%s2879_s6 + $0x9] sm:$0xff]  ;;  %s2796_s13 = smov [#allocation3]  }
  0x1f   : > { %523 = vrot.lane.b32.xlu1 %v2882_v0, %s2788_s7  ;;  %519 = vrot.lane.b32.xlu0 %v229_v1, %s2788_s7  ;;  %v2889_v2 = vld [vmem:[%s2879_s6 + $0x21] sm:$0xff]  ;;  %v2896_v4 = vld [vmem:[%s2879_s6 + $0x39] sm:$0xff]  ;;  %s2728_s14 = sshll.u32 %s2796_s13, 4  ;;  %s2729_s14 = int_to_ptr.vmem [resolvable:$false] %s2728_s14 }
  0x20   : > { %v2899_v5 = vld [vmem:[%s2879_s6 + $0x31] sm:$0xff]  ;;  %v2909_v7 = vld [vmem:[%s2879_s6 + $0x49] sm:$0xff]  ;;  %v2917_v9 = vld [vmem:[%s2879_s6 + $0x61] sm:$0xff]  ;;  %s2730_s15 = scalar_lea.vmem %s2729_s14, 8192 }
  0x21   : > { %v2906_v6 = vld [vmem:[%s2879_s6 + $0x51] sm:$0xff]  ;;  %v238_v8 = vld [vmem:[%s2879_s6 + $0x69] sm:$0xff]  ;;  %4494 = vst [vmem:[#allocation7_spill] sm:$0xff] %v2917_v9  ;;  %v240_v10 = vld [vmem:[%s2879_s6 + $0x81] sm:$0xff] }
  0x22   : > { %4493 = vst [vmem:[#allocation6_spill] sm:$0xff] %v2906_v6  ;;  %v239_v11 = vld [vmem:[%s2879_s6 + $0x79] sm:$0xff]  ;;  %v241_v13 = vld [vmem:[%s2879_s6 + $0x91] sm:$0xff]  ;;  %v243_v15 = vld [vmem:[%s2879_s6 + $0xa9] sm:$0xff] }
  0x23   : > { %525 = vrot.lane.b32.xlu1 %v2889_v2, %s2788_s7  ;;  %521 = vrot.lane.b32.xlu0 %v230_v3, %s2788_s7  ;;  %v242_v12 = vld [vmem:[%s2879_s6 + $0x99] sm:$0xff]  ;;  %v244_v14 = vld [vmem:[%s2879_s6 + $0xb1] sm:$0xff] }
  0x24   : > { %v246_v16 = vld [vmem:[%s2879_s6 + $0xc9] sm:$0xff]  ;;  %v245_v17 = vld [vmem:[%s2879_s6 + $0xc1] sm:$0xff]  ;;  %v2942_v19 = vld [vmem:[%s2879_s6 + $0xd9] sm:$0xff] }
  0x25   : > { %v2939_v18 = vld [vmem:[%s2879_s6 + $0xe1] sm:$0xff]  ;;  %v2949_v20 = vld [vmem:[%s2879_s6 + $0xf9] sm:$0xff]  ;;  %v2952_v21 = vld [vmem:[%s2879_s6 + $0xf1] sm:$0xff] }
  0x26   : > { %v2959_v22 = vld [vmem:[%s2879_s6 + $0x111] sm:$0xff]  ;;  %v2962_v23 = vld [vmem:[%s2879_s6 + $0x109] sm:$0xff]  ;;  %v2972_v25 = vld [vmem:[%s2879_s6 + $0x121] sm:$0xff] }
  0x27   : > { %529 = vrot.lane.b32.xlu1 %v2896_v4, %s2788_s7  ;;  %527 = vrot.lane.b32.xlu0 %v2899_v5, %s2788_s7  ;;  %4495 = vst [vmem:[#allocation8_spill] sm:$0xff] %v2959_v22  ;;  %4496 = vst [vmem:[#allocation9_spill] sm:$0xff] %v2962_v23  ;;  %v2969_v24 = vld [vmem:[%s2879_s6 + $0x129] sm:$0xff]  ;;  %v256_v26 = vld [vmem:[%s2879_s6 + $0x141] sm:$0xff] }
  0x28   : > { %4497 = vst [vmem:[#allocation10_spill] sm:$0xff] %v2969_v24  ;;  %4498 = vst [vmem:[#allocation11_spill] sm:$0xff] %v2972_v25  ;;  %v255_v27 = vld [vmem:[%s2879_s6 + $0x139] sm:$0xff]  ;;  %v257_v29 = vld [vmem:[%s2879_s6 + $0x151] sm:$0xff] }
  0x29   : > { %v258_v28 = vld [vmem:[%s2879_s6 + $0x159] sm:$0xff]  ;;  %v260_v30 = vld [vmem:[%s2879_s6 + $0x171] sm:$0xff]  ;;  %v259_v31 = vld [vmem:[%s2879_s6 + $0x169] sm:$0xff] }
  0x2a   : > { %v262_v32 = vld [vmem:[%s2879_s6 + $0xa] sm:$0xff]  ;;  %v261_v33 = vld [vmem:[%s2879_s6 + $0x2] sm:$0xff]  ;;  %v2998_v35 = vld [vmem:[%s2879_s6 + $0x1a] sm:$0xff] }
  0x2b   : > { %533 = vrot.lane.b32.xlu1 %v2906_v6, %s2788_s7  ;;  %531 = vrot.lane.b32.xlu0 %v2909_v7, %s2788_s7  ;;  %v2995_v34 = vld [vmem:[%s2879_s6 + $0x22] sm:$0xff]  ;;  %v3005_v36 = vld [vmem:[%s2879_s6 + $0x3a] sm:$0xff] }
  0x2c   : > { %4499 = vst [vmem:[#allocation12_spill] sm:$0xff] %v3005_v36  ;;  %v3008_v37 = vld [vmem:[%s2879_s6 + $0x32] sm:$0xff]  ;;  %v3018_v39 = vld [vmem:[%s2879_s6 + $0x4a] sm:$0xff]  ;;  %v3028_v41 = vld [vmem:[%s2879_s6 + $0x62] sm:$0xff] }
  0x2d   : > { %v3015_v38 = vld [vmem:[%s2879_s6 + $0x52] sm:$0xff]  ;;  %4501 = vst [vmem:[#allocation14_spill] sm:$0xff] %v3018_v39  ;;  %v3025_v40 = vld [vmem:[%s2879_s6 + $0x6a] sm:$0xff]  ;;  %4503 = vst [vmem:[#allocation16_spill] sm:$0xff] %v3028_v41 }
  0x2e   : > { %4500 = vst [vmem:[#allocation13_spill] sm:$0xff] %v3015_v38  ;;  %4502 = vst [vmem:[#allocation15_spill] sm:$0xff] %v3025_v40  ;;  %v272_v42 = vld [vmem:[%s2879_s6 + $0x82] sm:$0xff]  ;;  %v271_v43 = vld [vmem:[%s2879_s6 + $0x7a] sm:$0xff] }
  0x2f   : > { %537 = vrot.lane.b32.xlu1 %v238_v8, %s2788_s7  ;;  %535 = vrot.lane.b32.xlu0 %v2917_v9, %s2788_s7  ;;  %v274_v44 = vld [vmem:[%s2879_s6 + $0x9a] sm:$0xff]  ;;  %v273_v45 = vld [vmem:[%s2879_s6 + $0x92] sm:$0xff] }
  0x30   : > { %v276_v46 = vld [vmem:[%s2879_s6 + $0xb2] sm:$0xff]  ;;  %v275_v47 = vld [vmem:[%s2879_s6 + $0xaa] sm:$0xff]  ;;  %v277_v49 = vld [vmem:[%s2879_s6 + $0xc2] sm:$0xff] }
  0x31   : > { %v278_v48 = vld [vmem:[%s2879_s6 + $0xca] sm:$0xff]  ;;  %v3051_v50 = vld [vmem:[%s2879_s6 + $0xe2] sm:$0xff]  ;;  %v3054_v51 = vld [vmem:[%s2879_s6 + $0xda] sm:$0xff] }
  0x32   : > { %v3061_v52 = vld [vmem:[%s2879_s6 + $0xfa] sm:$0xff]  ;;  %v3064_v53 = vld [vmem:[%s2879_s6 + $0xf2] sm:$0xff]  ;;  %v3074_v55 = vld [vmem:[%s2879_s6 + $0x10a] sm:$0xff] }
  0x33   : > { %541 = vrot.lane.b32.xlu1 %v240_v10, %s2788_s7  ;;  %539 = vrot.lane.b32.xlu0 %v239_v11, %s2788_s7  ;;  %4504 = vst [vmem:[#allocation17_spill] sm:$0xff] %v3061_v52  ;;  %v3071_v54 = vld [vmem:[%s2879_s6 + $0x112] sm:$0xff]  ;;  %4506 = vst [vmem:[#allocation19_spill] sm:$0xff] %v3074_v55  ;;  %v3081_v56 = vld [vmem:[%s2879_s6 + $0x12a] sm:$0xff] }
  0x34   : > { %4505 = vst [vmem:[#allocation18_spill] sm:$0xff] %v3071_v54  ;;  %4507 = vst [vmem:[#allocation20_spill] sm:$0xff] %v3081_v56  ;;  %v3084_v57 = vld [vmem:[%s2879_s6 + $0x122] sm:$0xff]  ;;  %v287_v59 = vld [vmem:[%s2879_s6 + $0x13a] sm:$0xff] }
  0x35   : > { %4508 = vst [vmem:[#allocation21_spill] sm:$0xff] %v3084_v57  ;;  %v288_v58 = vld [vmem:[%s2879_s6 + $0x142] sm:$0xff]  ;;  %v290_v62 = vld [vmem:[%s2879_s6 + $0x15a] sm:$0xff]  ;;  %v289_v63 = vld [vmem:[%s2879_s6 + $0x152] sm:$0xff] }
  0x36   : > { %v292_v8 = vld [vmem:[%s2879_s6 + $0x172] sm:$0xff]  ;;  %v291_v10 = vld [vmem:[%s2879_s6 + $0x16a] sm:$0xff] }
  0x37   : > { %545 = vrot.lane.b32.xlu1 %v242_v12, %s2788_s7  ;;  %543 = vrot.lane.b32.xlu0 %v241_v13, %s2788_s7 }
  0x3b   : > { %549 = vrot.lane.b32.xlu1 %v244_v14, %s2788_s7  ;;  %547 = vrot.lane.b32.xlu0 %v243_v15, %s2788_s7  ;;  %v3119_v15 = vld [vmem:[%s2879_s6 + $0x18] sm:$0xff] }
  0x3c   : > { %4513 = vst [vmem:[#allocation26_spill] sm:$0xff] %v3119_v15 }
  0x3f   : > { %553 = vrot.lane.b32.xlu1 %v246_v16, %s2788_s7  ;;  %551 = vrot.lane.b32.xlu0 %v245_v17, %s2788_s7  ;;  %v3122_v16 = vld [vmem:[%s2879_s6 + $0x20] sm:$0xff] }
  0x40   : > { %4514 = vst [vmem:[#allocation27_spill] sm:$0xff] %v3122_v16 }
  0x43   : > { %557 = vrot.lane.b32.xlu1 %v2939_v18, %s2788_s7  ;;  %555 = vrot.lane.b32.xlu0 %v2942_v19, %s2788_s7 }
  0x47   : > { %561 = vrot.lane.b32.xlu1 %v2949_v20, %s2788_s7  ;;  %559 = vrot.lane.b32.xlu0 %v2952_v21, %s2788_s7 }
  0x4b   : > { %565 = vrot.lane.b32.xlu1 %v2959_v22, %s2788_s7  ;;  %563 = vrot.lane.b32.xlu0 %v2962_v23, %s2788_s7  ;;  %v3299_v23 = vld [vmem:[%s2879_s6 + $0x158] sm:$0xff] }
  0x4f   : > { %569 = vrot.lane.b32.xlu1 %v2969_v24, %s2788_s7  ;;  %567 = vrot.lane.b32.xlu0 %v2972_v25, %s2788_s7  ;;  %v227_v24 = vld [vmem:[%s2879_s6 + $0x168] sm:$0xff] }
  0x53   : > { %573 = vrot.lane.b32.xlu1 %v256_v26, %s2788_s7  ;;  %571 = vrot.lane.b32.xlu0 %v255_v27, %s2788_s7  ;;  %v3133_v27 = vld [vmem:[%s2879_s6 + $0x38] sm:$0xff] }
  0x57   : > { %577 = vrot.lane.b32.xlu1 %v258_v28, %s2788_s7  ;;  %575 = vrot.lane.b32.xlu0 %v257_v29, %s2788_s7  ;;  %v3136_v28 = vld [vmem:[%s2879_s6 + $0x30] sm:$0xff] }
  0x5b   : > { %581 = vrot.lane.b32.xlu1 %v260_v30, %s2788_s7  ;;  %579 = vrot.lane.b32.xlu0 %v259_v31, %s2788_s7  ;;  %v3147_v31 = vld [vmem:[%s2879_s6 + $0x50] sm:$0xff] }
  0x5f   : > { %649 = vrot.lane.b32.xlu1 %v262_v32, %s2789_s8  ;;  %647 = vrot.lane.b32.xlu0 %v261_v33, %s2789_s8  ;;  %v3150_v32 = vld [vmem:[%s2879_s6 + $0x48] sm:$0xff]  ;;  %v210_v33 = vld [vmem:[%s2879_s6 + $0x98] sm:$0xff] }
  0x63   : > { %653 = vrot.lane.b32.xlu1 %v2995_v34, %s2789_s8  ;;  %651 = vrot.lane.b32.xlu0 %v2998_v35, %s2789_s8 }
  0x67   : > { %657 = vrot.lane.b32.xlu1 %v3005_v36, %s2789_s8  ;;  %655 = vrot.lane.b32.xlu0 %v3008_v37, %s2789_s8 }
  0x6b   : > { %661 = vrot.lane.b32.xlu1 %v3015_v38, %s2789_s8  ;;  %659 = vrot.lane.b32.xlu0 %v3018_v39, %s2789_s8  ;;  %v3279_v38 = vld [vmem:[%s2879_s6 + $0x140] sm:$0xff] }
  0x6f   : > { %665 = vrot.lane.b32.xlu1 %v3025_v40, %s2789_s8  ;;  %663 = vrot.lane.b32.xlu0 %v3028_v41, %s2789_s8  ;;  %v3270_v41 = vld [vmem:[%s2879_s6 + $0x120] sm:$0xff] }
  0x73   : > { %669 = vrot.lane.b32.xlu1 %v272_v42, %s2789_s8  ;;  %667 = vrot.lane.b32.xlu0 %v271_v43, %s2789_s8  ;;  %v209_v42 = vld [vmem:[%s2879_s6 + $0x90] sm:$0xff] }
  0x77   : > { %673 = vrot.lane.b32.xlu1 %v274_v44, %s2789_s8  ;;  %671 = vrot.lane.b32.xlu0 %v273_v45, %s2789_s8  ;;  %v3159_v45 = vld [vmem:[%s2879_s6 + $0x68] sm:$0xff] }
  0x7b   : > { %677 = vrot.lane.b32.xlu1 %v276_v46, %s2789_s8  ;;  %675 = vrot.lane.b32.xlu0 %v275_v47, %s2789_s8  ;;  %v3162_v46 = vld [vmem:[%s2879_s6 + $0x60] sm:$0xff] }
  0x7f   : > { %681 = vrot.lane.b32.xlu1 %v278_v48, %s2789_s8  ;;  %679 = vrot.lane.b32.xlu0 %v277_v49, %s2789_s8  ;;  %v212_v49 = vld [vmem:[%s2879_s6 + $0xb0] sm:$0xff] }
  0x83   : > { %685 = vrot.lane.b32.xlu1 %v3051_v50, %s2789_s8  ;;  %683 = vrot.lane.b32.xlu0 %v3054_v51, %s2789_s8 }
  0x87   : > { %689 = vrot.lane.b32.xlu1 %v3061_v52, %s2789_s8  ;;  %687 = vrot.lane.b32.xlu0 %v3064_v53, %s2789_s8  ;;  %v3302_v52 = vld [vmem:[%s2879_s6 + $0x150] sm:$0xff] }
  0x88   : > { %4527 = vst [vmem:[#allocation40_spill] sm:$0xff] %v3302_v52 }
  0x8b   : > { %693 = vrot.lane.b32.xlu1 %v3071_v54, %s2789_s8  ;;  %691 = vrot.lane.b32.xlu0 %v3074_v55, %s2789_s8  ;;  %v3282_v54 = vld [vmem:[%s2879_s6 + $0x138] sm:$0xff] }
  0x8f   : > { %697 = vrot.lane.b32.xlu1 %v3081_v56, %s2789_s8  ;;  %695 = vrot.lane.b32.xlu0 %v3084_v57, %s2789_s8  ;;  %v3267_v56 = vld [vmem:[%s2879_s6 + $0x128] sm:$0xff]  ;;  %v228_v57 = vld [vmem:[%s2879_s6 + $0x170] sm:$0xff] }
  0x91   : > { %v3092_v60 = vpop.permute.xlu1 %523  ;;  %v3094_v61 = vpop.permute.xlu0 %519 }
  0x92   : > { %4509 = vst [vmem:[#allocation22_spill] sm:$0xff] %v3092_v60  ;;  %4510 = vst [vmem:[#allocation23_spill] sm:$0xff] %v3094_v61 }
  0x93   : > { %701 = vrot.lane.b32.xlu1 %v288_v58, %s2789_s8  ;;  %699 = vrot.lane.b32.xlu0 %v287_v59, %s2789_s8  ;;  %v211_v58 = vld [vmem:[%s2879_s6 + $0xa8] sm:$0xff] }
  0x95   : > { %v3100_v1 = vpop.permute.xlu1 %525  ;;  %v3102_v3 = vpop.permute.xlu0 %521 }
  0x96   : > { %4511 = vst [vmem:[#allocation24_spill] sm:$0xff] %v3100_v1  ;;  %4512 = vst [vmem:[#allocation25_spill] sm:$0xff] %v3102_v3  ;;  %v3205_v1 = vld [vmem:[%s2879_s6 + $0xf0] sm:$0xff]  ;;  %v3242_v3 = vld [vmem:[%s2879_s6 + $0xf8] sm:$0xff] }
  0x97   : > { %705 = vrot.lane.b32.xlu1 %v290_v62, %s2789_s8  ;;  %703 = vrot.lane.b32.xlu0 %v289_v63, %s2789_s8  ;;  %v3177_v63 = vld [vmem:[%s2879_s6 + $0x80] sm:$0xff] }
  0x99   : > { %v3108_v11 = vpop.permute.xlu1 %529  ;;  %v3110_v12 = vpop.permute.xlu0 %527 }
  0x9a   : > { %v1517_v36 = vsel %vm1511_vm0, %v3133_v27, %v3108_v11 }
  0x9b   : > { %709 = vrot.lane.b32.xlu1 %v292_v8, %s2789_s8  ;;  %707 = vrot.lane.b32.xlu0 %v291_v10, %s2789_s8  ;;  %v3180_v8 = vld [vmem:[%s2879_s6 + $0x78] sm:$0xff] }
  0x9d   : > { %v3114_v13 = vpop.permute.xlu1 %533  ;;  %v3116_v14 = vpop.permute.xlu0 %531 }
  0x9e   : > { %v1518_v11 = vsel %vm1511_vm0, %v3150_v32, %v3116_v14 }
  0x9f   : > { %777 = vrot.lane.b32.xlu1 %v3122_v16, %s2790_s9  ;;  %775 = vrot.lane.b32.xlu0 %v3119_v15, %s2790_s9 }
  0xa1   : > { %v3128_v17 = vpop.permute.xlu1 %537  ;;  %v3130_v26 = vpop.permute.xlu0 %535 }
  0xa3   : > { %781 = vrot.lane.b32.xlu1 %v3133_v27, %s2790_s9  ;;  %779 = vrot.lane.b32.xlu0 %v3136_v28, %s2790_s9 }
  0xa5   : > { %v3142_v29 = vpop.permute.xlu1 %541  ;;  %v3144_v30 = vpop.permute.xlu0 %539 }
  0xa7   : > { %785 = vrot.lane.b32.xlu1 %v3147_v31, %s2790_s9  ;;  %783 = vrot.lane.b32.xlu0 %v3150_v32, %s2790_s9 }
  0xa9   : > { %v546_v43 = vpop.permute.xlu1 %545  ;;  %v544_v44 = vpop.permute.xlu0 %543 }
  0xaa   : > { %v3165_v47 = vsel %vm1511_vm0, %v210_v33, %v546_v43  ;;  %v3168_v48 = vsel %vm1511_vm0, %v209_v42, %v544_v44 }
  0xab   : > { %789 = vrot.lane.b32.xlu1 %v3159_v45, %s2790_s9  ;;  %787 = vrot.lane.b32.xlu0 %v3162_v46, %s2790_s9 }
  0xad   : > { %v550_v59 = vpop.permute.xlu1 %549  ;;  %v548_v62 = vpop.permute.xlu0 %547 }
  0xae   : > { %v3183_v10 = vsel %vm1511_vm0, %v212_v49, %v550_v59  ;;  %v3186_v43 = vsel %vm1511_vm0, %v211_v58, %v548_v62 }
  0xaf   : > { %793 = vrot.lane.b32.xlu1 %v3177_v63, %s2790_s9  ;;  %791 = vrot.lane.b32.xlu0 %v3180_v8, %s2790_s9 }
  0xb1   : > { %v3192_v44 = vpop.permute.xlu1 %553  ;;  %v3194_v16 = vpop.permute.xlu0 %551 }
  0xb2   : > { %4515 = vst [vmem:[#allocation28_spill] sm:$0xff] %v3192_v44  ;;  %4516 = vst [vmem:[#allocation29_spill] sm:$0xff] %v3194_v16  ;;  %v3210_v44 = vld [vmem:[%s2879_s6 + $0xc8] sm:$0xff] }
  0xb3   : > { %797 = vrot.lane.b32.xlu1 %v210_v33, %s2790_s9  ;;  %795 = vrot.lane.b32.xlu0 %v209_v42, %s2790_s9  ;;  %4519 = vst [vmem:[#allocation32_spill] sm:$0xff] %v3210_v44  ;;  %v3213_v33 = vld [vmem:[%s2879_s6 + $0xc0] sm:$0xff]  ;;  %v3256_v16 = vld [vmem:[%s2879_s6 + $0x108] sm:$0xff] }
  0xb4   : > { %4520 = vst [vmem:[#allocation33_spill] sm:$0xff] %v3213_v33 }
  0xb5   : > { %v3198_v59 = vpop.permute.xlu1 %557  ;;  %v3200_v62 = vpop.permute.xlu0 %555 }
  0xb6   : > { %4517 = vst [vmem:[#allocation30_spill] sm:$0xff] %v3198_v59  ;;  %4518 = vst [vmem:[#allocation31_spill] sm:$0xff] %v3200_v62  ;;  %v3228_v59 = vld [vmem:[%s2879_s6 + $0xe0] sm:$0xff]  ;;  %v3231_v62 = vld [vmem:[%s2879_s6 + $0xd8] sm:$0xff] }
  0xb7   : > { %801 = vrot.lane.b32.xlu1 %v212_v49, %s2790_s9  ;;  %799 = vrot.lane.b32.xlu0 %v211_v58, %s2790_s9  ;;  %4521 = vst [vmem:[#allocation34_spill] sm:$0xff] %v3228_v59  ;;  %4522 = vst [vmem:[#allocation35_spill] sm:$0xff] %v3231_v62 }
  0xb9   : > { %v3207_v15 = vpop.permute.xlu1 %561  ;;  %v560_v60 = vpop.permute.xlu0 %559 }
  0xba   : > { %v3217_v42 = vsel %vm1511_vm0, %v3205_v1, %v560_v60 }
  0xbb   : > { %805 = vrot.lane.b32.xlu1 %v3210_v44, %s2790_s9  ;;  %803 = vrot.lane.b32.xlu0 %v3213_v33, %s2790_s9 }
  0xbd   : > { %v3223_v49 = vpop.permute.xlu1 %565  ;;  %v3225_v58 = vpop.permute.xlu0 %563 }
  0xbf   : > { %809 = vrot.lane.b32.xlu1 %v3228_v59, %s2790_s9  ;;  %807 = vrot.lane.b32.xlu0 %v3231_v62, %s2790_s9  ;;  %v3253_v62 = vld [vmem:[%s2879_s6 + $0x110] sm:$0xff] }
  0xc1   : > { %v3237_v60 = vpop.permute.xlu1 %569  ;;  %v3239_v44 = vpop.permute.xlu0 %567 }
  0xc3   : > { %813 = vrot.lane.b32.xlu1 %v3242_v3, %s2790_s9  ;;  %811 = vrot.lane.b32.xlu0 %v3205_v1, %s2790_s9 }
  0xc5   : > { %v3248_v33 = vpop.permute.xlu1 %573  ;;  %v3250_v59 = vpop.permute.xlu0 %571 }
  0xc7   : > { %817 = vrot.lane.b32.xlu1 %v3253_v62, %s2790_s9  ;;  %815 = vrot.lane.b32.xlu0 %v3256_v16, %s2790_s9 }
  0xc9   : > { %v3262_v61 = vpop.permute.xlu1 %577  ;;  %v3264_v40 = vpop.permute.xlu0 %575 }
  0xcb   : > { %821 = vrot.lane.b32.xlu1 %v3267_v56, %s2790_s9  ;;  %819 = vrot.lane.b32.xlu0 %v3270_v41, %s2790_s9 }
  0xcd   : > { %v582_v9 = vpop.permute.xlu1 %581  ;;  %v580_v25 = vpop.permute.xlu0 %579 }
  0xce   : > { %v3285_v39 = vsel %vm1511_vm0, %v228_v57, %v582_v9  ;;  %v3288_v55 = vsel %vm1511_vm0, %v227_v24, %v580_v25 }
  0xcf   : > { %4523 = vst [vmem:[#allocation36_spill] sm:$0xff] %v3285_v39  ;;  %4524 = vst [vmem:[#allocation37_spill] sm:$0xff] %v3288_v55  ;;  %825 = vrot.lane.b32.xlu1 %v3279_v38, %s2790_s9  ;;  %823 = vrot.lane.b32.xlu0 %v3282_v54, %s2790_s9  ;;  %v1516_v55 = vsel %vm1511_vm0, %v3136_v28, %v3110_v12 }
  0xd1   : > { %v3294_v6 = vpop.permute.xlu1 %649  ;;  %v3296_v22 = vpop.permute.xlu0 %647 }
  0xd2   : > { %4525 = vst [vmem:[#allocation38_spill] sm:$0xff] %v3294_v6  ;;  %4526 = vst [vmem:[#allocation39_spill] sm:$0xff] %v3296_v22  ;;  %v2299_v6 = vld [vmem:[%s2879_s6 + $0x188] sm:$0xff]  ;;  %v2298_v22 = vld [vmem:[%s2879_s6 + $0x180] sm:$0xff] }
  0xd3   : > { %829 = vrot.lane.b32.xlu1 %v3299_v23, %s2790_s9  ;;  %827 = vrot.lane.b32.xlu0 %v3302_v52, %s2790_s9 }
  0xd5   : > { %v3308_v9 = vpop.permute.xlu1 %653  ;;  %v3310_v25 = vpop.permute.xlu0 %651 }
  0xd6   : > { %4528 = vst [vmem:[#allocation41_spill] sm:$0xff] %v3308_v9  ;;  %4529 = vst [vmem:[#allocation42_spill] sm:$0xff] %v3310_v25 }
  0xd7   : > { %833 = vrot.lane.b32.xlu1 %v228_v57, %s2790_s9  ;;  %831 = vrot.lane.b32.xlu0 %v227_v24, %s2790_s9  ;;  %v1519_v24 = vsel %vm1511_vm0, %v3147_v31, %v3114_v13 }
  0xd9   : > { %v658_v39 = vpop.permute.xlu1 %657  ;;  %v656_v52 = vpop.permute.xlu0 %655 }
  0xda   : > { %v3323_v9 = vsel %vm1544_vm1, %v1517_v36, %v658_v39  ;;  %v3326_v57 = vsel %vm1544_vm1, %v1516_v55, %v656_v52  ;;  %v1521_v52 = vsel %vm1511_vm0, %v3159_v45, %v3128_v17  ;;  %v1520_v55 = vsel %vm1511_vm0, %v3162_v46, %v3130_v26  ;;  %v1810_v17 = vld [vmem:[%s4448_s1 + $0x10] sm:$0xff]  ;;  %v1811_v26 = vld [vmem:[%s4448_s1 + $0x18] sm:$0xff] }
  0xdb   : > { %837 = vrot.lane.b32.xlu1 %v2299_v6, %s2790_s9  ;;  %835 = vrot.lane.b32.xlu0 %v2298_v22, %s2790_s9  ;;  %v1808_v6 = vld [vmem:[%s4448_s1] sm:$0xff]  ;;  %v1809_v22 = vld [vmem:[%s4448_s1 + $0x8] sm:$0xff]  ;;  %s4395_s9 = scalar_lea.hbm %s4451_s4, %s2498_s29 }
  0xdc   : > { %v2627_v14 = vpack.c.bf16 %v1809_v22, %v1808_v6  ;;  %v2631_v22 = vpack.c.bf16 %v1811_v26, %v1810_v17  ;;  %v1814_v26 = vld [vmem:[%s4448_s1 + $0x30] sm:$0xff] }
  0xdd   : > { %v662_v12 = vpop.permute.xlu1 %661  ;;  %v660_v25 = vpop.permute.xlu0 %659 }
  0xde   : > { %v3337_v36 = vsel %vm1544_vm1, %v1519_v24, %v662_v12  ;;  %v3340_v39 = vsel %vm1544_vm1, %v1518_v11, %v660_v25  ;;  %2628 = vmatprep.subr.bf16.mxu0 %v2627_v14  ;;  %2659 = vmatprep.subr.bf16.mxu1 %v2627_v14  ;;  %v1523_v24 = vsel %vm1511_vm0, %v3177_v63, %v3142_v29  ;;  %v1812_v29 = vld [vmem:[%s4448_s1 + $0x20] sm:$0xff] }
  0xdf   : > { %905 = vrot.lane.b32.xlu1 %v2889_v2, %s2791_s10  ;;  %903 = vrot.lane.b32.xlu0 %v2882_v0, %s2791_s10  ;;  %v1522_v11 = vsel %vm1511_vm0, %v3180_v8, %v3144_v30  ;;  %v1813_v30 = vld [vmem:[%s4448_s1 + $0x28] sm:$0xff] }
  0xe0   : > { %2630 = vmatpush3.bf16.msra.mxu0 %v2627_v14  ;;  %2667 = vmatpush3.bf16.msra.mxu1 %v2627_v14  ;;  %v2635_v14 = vpack.c.bf16 %v1813_v30, %v1812_v29 }
  0xe1   : > { %v666_v2 = vpop.permute.xlu1 %665  ;;  %v664_v13 = vpop.permute.xlu0 %663  ;;  %2632 = vmatprep.subr.bf16.mxu0 %v2631_v22  ;;  %2660 = vmatprep.subr.bf16.mxu1 %v2631_v22 }
  0xe2   : > { %v3359_v0 = vsel %vm1544_vm1, %v1521_v52, %v666_v2  ;;  %v3362_v25 = vsel %vm1544_vm1, %v1520_v55, %v664_v13 }
  0xe3   : > { %909 = vrot.lane.b32.xlu1 %v2896_v4, %s2791_s10  ;;  %907 = vrot.lane.b32.xlu0 %v2899_v5, %s2791_s10 }
  0xe4   : > { %2634 = vmatpush3.bf16.msra.mxu0 %v2631_v22  ;;  %2668 = vmatpush3.bf16.msra.mxu1 %v2631_v22 }
  0xe5   : > { %v670_v12 = vpop.permute.xlu1 %669  ;;  %v668_v6 = vpop.permute.xlu0 %667  ;;  %2636 = vmatprep.subr.bf16.mxu0 %v2635_v14  ;;  %2661 = vmatprep.subr.bf16.mxu1 %v2635_v14 }
  0xe6   : > { %v3381_v52 = vsel %vm1544_vm1, %v1523_v24, %v670_v12  ;;  %v3384_v55 = vsel %vm1544_vm1, %v1522_v11, %v668_v6  ;;  %v1816_v12 = vld [vmem:[%s4448_s1 + $0x40] sm:$0xff] }
  0xe7   : > { %935 = vrot.lane.b32.xlu1 %v2942_v19, %s2791_s10  ;;  %911 = vrot.lane.b32.xlu0 %v2909_v7, %s2791_s10 }
  0xe8   : > { %2638 = vmatpush3.bf16.msra.mxu0 %v2635_v14  ;;  %2669 = vmatpush3.bf16.msra.mxu1 %v2635_v14 }
  0xe9   : > { %v674_v2 = vpop.permute.xlu1 %673  ;;  %v672_v13 = vpop.permute.xlu0 %671 }
  0xea   : > { %v3398_v19 = vsel %vm1544_vm1, %v3165_v47, %v674_v2  ;;  %v3402_v17 = vsel %vm1544_vm1, %v3168_v48, %v672_v13  ;;  %v1815_v47 = vld [vmem:[%s4448_s1 + $0x38] sm:$0xff]  ;;  %v1533_v13 = vsel %vm1511_vm0, %v3242_v3, %v3207_v15  ;;  %v1535_v15 = vsel %vm1511_vm0, %v3253_v62, %v3223_v49 }
  0xeb   : > { %1031 = vrot.lane.b32.xlu1 %v2998_v35, %s2792_s5  ;;  %937 = vrot.lane.b32.xlu0 %v2939_v18, %s2791_s10  ;;  %v2639_v11 = vpack.c.bf16 %v1815_v47, %v1814_v26 }
  0xed   : > { %v678_v24 = vpop.permute.xlu1 %677  ;;  %v676_v48 = vpop.permute.xlu0 %675  ;;  %2640 = vmatprep.subr.bf16.mxu0 %v2639_v11  ;;  %2662 = vmatprep.subr.bf16.mxu1 %v2639_v11 }
  0xee   : > { %v3416_v35 = vsel %vm1544_vm1, %v3183_v10, %v678_v24  ;;  %v3420_v18 = vsel %vm1544_vm1, %v3186_v43, %v676_v48  ;;  %v1817_v10 = vld [vmem:[%s4448_s1 + $0x48] sm:$0xff]  ;;  %2642 = vmatpush3.bf16.msra.mxu0 %v2639_v11  ;;  %2670 = vmatpush3.bf16.msra.mxu1 %v2639_v11  ;;  %v1534_v24 = vsel %vm1511_vm0, %v3256_v16, %v3225_v58 }
  0xef   : > { %1033 = vrot.lane.b32.xlu1 %v2995_v34, %s2792_s5  ;;  %1063 = vrot.lane.b32.xlu0 %v3054_v51, %s2792_s5  ;;  %v2643_v22 = vpack.c.bf16 %v1817_v10, %v1816_v12  ;;  %v1818_v34 = vld [vmem:[%s4448_s1 + $0x50] sm:$0xff]  ;;  %v1819_v51 = vld [vmem:[%s4448_s1 + $0x58] sm:$0xff]  ;;  %v1537_v58 = vsel %vm1511_vm0, %v3267_v56, %v3237_v60  ;;  %v1536_v10 = vsel %vm1511_vm0, %v3270_v41, %v3239_v44 }
  0xf0   : > { %v2647_v2 = vpack.c.bf16 %v1819_v51, %v1818_v34  ;;  %v1538_v44 = vsel %vm1511_vm0, %v3282_v54, %v3250_v59  ;;  %v4530_v59 = vld [vmem:[#allocation40_spill] sm:$0xff] }
  0xf1   : > { %v3432_v6 = vpop.permute.xlu1 %681  ;;  %v3434_v43 = vpop.permute.xlu0 %679  ;;  %2644 = vmatprep.subr.bf16.mxu0 %v2643_v22  ;;  %2663 = vmatprep.subr.bf16.mxu1 %v2643_v22 }
  0xf2   : > { %2646 = vmatpush3.bf16.msra.mxu0 %v2643_v22  ;;  %2671 = vmatpush3.bf16.msra.mxu1 %v2643_v22 }
  0xf3   : > { %1159 = vrot.lane.b32.xlu1 %v3136_v28, %s2793_s21  ;;  %1065 = vrot.lane.b32.xlu0 %v3051_v50, %s2792_s5  ;;  %v1820_v50 = vld [vmem:[%s4448_s1 + $0x60] sm:$0xff]  ;;  %v1821_v28 = vld [vmem:[%s4448_s1 + $0x68] sm:$0xff] }
  0xf4   : > { %2648 = vmatprep.subr.bf16.mxu0 %v2647_v2  ;;  %2664 = vmatprep.subr.bf16.mxu1 %v2647_v2 }
  0xf5   : > { %v3446_v29 = vpop.permute.xlu1 %685  ;;  %v3448_v30 = vpop.permute.xlu0 %683 }
  0xf6   : > { %2650 = vmatpush3.bf16.msra.mxu0 %v2647_v2  ;;  %2672 = vmatpush3.bf16.msra.mxu1 %v2647_v2 }
  0xf7   : > { %1161 = vrot.lane.b32.xlu1 %v3133_v27, %s2793_s21  ;;  %1191 = vrot.lane.b32.xlu0 %v3205_v1, %s2793_s21  ;;  %v2651_v27 = vpack.c.bf16 %v1821_v28, %v1820_v50 }
  0xf9   : > { %v690_v14 = vpop.permute.xlu1 %689  ;;  %v688_v26 = vpop.permute.xlu0 %687  ;;  %2652 = vmatprep.subr.bf16.mxu0 %v2651_v27  ;;  %2665 = vmatprep.subr.bf16.mxu1 %v2651_v27 }
  0xfa   : > { %v3464_v1 = vsel %vm1544_vm1, %v1533_v13, %v690_v14  ;;  %v3468_v47 = vsel %vm1544_vm1, %v3217_v42, %v688_v26  ;;  %2654 = vmatpush3.bf16.msra.mxu0 %v2651_v27  ;;  %2673 = vmatpush3.bf16.msra.mxu1 %v2651_v27 }
  0xfb   : > { %1287 = vrot.lane.b32.xlu1 %v2899_v5, %s2794_s12  ;;  %1193 = vrot.lane.b32.xlu0 %v3242_v3, %s2793_s21  ;;  %v1822_v5 = vld [vmem:[%s4448_s1 + $0x70] sm:$0xff]  ;;  %v1823_v3 = vld [vmem:[%s4448_s1 + $0x78] sm:$0xff] }
  0xfc   : > { %v2655_v12 = vpack.c.bf16 %v1823_v3, %v1822_v5  ;;  %v4533_v3 = vld [vmem:[#allocation12_spill] sm:$0xff] }
  0xfd   : > { %v694_v48 = vpop.permute.xlu1 %693  ;;  %v692_v42 = vpop.permute.xlu0 %691 }
  0xfe   : > { %v3487_v11 = vsel %vm1544_vm1, %v1535_v15, %v694_v48  ;;  %v3490_v49 = vsel %vm1544_vm1, %v1534_v24, %v692_v42  ;;  %2656 = vmatprep.subr.bf16.mxu0 %v2655_v12  ;;  %2666 = vmatprep.subr.bf16.mxu1 %v2655_v12  ;;  %v4531_v48 = vld [vmem:[#allocation36_spill] sm:$0xff] }
  0xff   : > { %939 = vrot.lane.b32.xlu1 %v2952_v21, %s2791_s10  ;;  %1319 = vrot.lane.b32.xlu0 %v2952_v21, %s2794_s12  ;;  %v1539_v21 = vsel %vm1511_vm0, %v3279_v38, %v3248_v33  ;;  %v1540_v33 = vsel %vm1511_vm0, %v4530_v59, %v3264_v40  ;;  %v4532_v40 = vld [vmem:[#allocation37_spill] sm:$0xff] }
 0x100   : > { %2658 = vmatpush3.bf16.msra.mxu0 %v2655_v12  ;;  %2674 = vmatpush3.bf16.msra.mxu1 %v2655_v12 }
 0x101   : > { %v698_v22 = vpop.permute.xlu1 %697  ;;  %v696_v34 = vpop.permute.xlu0 %695 }
 0x102   : > { %v3503_v51 = vsel %vm1544_vm1, %v1537_v58, %v698_v22  ;;  %v3506_v2 = vsel %vm1544_vm1, %v1536_v10, %v696_v34 }
 0x103   : > { %1321 = vrot.lane.b32.xlu1 %v2949_v20, %s2794_s12  ;;  %1289 = vrot.lane.b32.xlu0 %v2896_v4, %s2794_s12  ;;  %v1541_v4 = vsel %vm1511_vm0, %v3299_v23, %v3262_v61 }
 0x105   : > { %v702_v60 = vpop.permute.xlu1 %701  ;;  %v700_v50 = vpop.permute.xlu0 %699 }
 0x106   : > { %v3519_v28 = vsel %vm1544_vm1, %v1539_v21, %v702_v60  ;;  %v3522_v13 = vsel %vm1544_vm1, %v1538_v44, %v700_v50  ;;  %v4535_v50 = vld [vmem:[#allocation9_spill] sm:$0xff] }
 0x107   : > { %1447 = vrot.lane.b32.xlu1 %v3064_v53, %s2795_s23  ;;  %1415 = vrot.lane.b32.xlu0 %v3008_v37, %s2795_s23 }
 0x109   : > { %v706_v14 = vpop.permute.xlu1 %705  ;;  %v704_v26 = vpop.permute.xlu0 %703 }
 0x10a   : > { %v3535_v27 = vsel %vm1544_vm1, %v1541_v4, %v706_v14  ;;  %v3538_v15 = vsel %vm1544_vm1, %v1540_v33, %v704_v26  ;;  %v4536_v4 = vld [vmem:[#allocation8_spill] sm:$0xff] }
 0x10b   : > { %1035 = vrot.lane.b32.xlu1 %v3008_v37, %s2792_s5  ;;  %941 = vrot.lane.b32.xlu0 %v2949_v20, %s2791_s10  ;;  %v4534_v20 = vld [vmem:[#allocation17_spill] sm:$0xff] }
 0x10d   : > { %v710_v24 = vpop.permute.xlu1 %709  ;;  %v708_v61 = vpop.permute.xlu0 %707 }
 0x10e   : > { %v3546_v42 = vsel %vm1544_vm1, %v4531_v48, %v710_v24  ;;  %v3550_v5 = vsel %vm1544_vm1, %v4532_v40, %v708_v61  ;;  %v4539_v24 = vld [vmem:[#allocation19_spill] sm:$0xff] }
 0x10f   : > { %1417 = vrot.lane.b32.xlu1 %v4533_v3, %s2795_s23  ;;  %1067 = vrot.lane.b32.xlu0 %v3064_v53, %s2792_s5 }
 0x111   : > { %v3556_v37 = vpop.permute.xlu1 %777  ;;  %v3558_v12 = vpop.permute.xlu0 %775 }
 0x113   : > { %1037 = vrot.lane.b32.xlu1 %v4533_v3, %s2792_s5  ;;  %1449 = vrot.lane.b32.xlu0 %v4534_v20, %s2795_s23 }
 0x115   : > { %v3564_v58 = vpop.permute.xlu1 %781  ;;  %v3566_v10 = vpop.permute.xlu0 %779 }
 0x117   : > { %1163 = vrot.lane.b32.xlu1 %v3150_v32, %s2793_s21  ;;  %1069 = vrot.lane.b32.xlu0 %v4534_v20, %s2792_s5  ;;  %v4543_v20 = vld [vmem:[#allocation18_spill] sm:$0xff] }
 0x119   : > { %v786_v53 = vpop.permute.xlu1 %785  ;;  %v784_v22 = vpop.permute.xlu0 %783 }
 0x11a   : > { %v3574_v34 = vsel %vm1577_vm2, %v3323_v9, %v786_v53  ;;  %v3578_v21 = vsel %vm1577_vm2, %v3326_v57, %v784_v22  ;;  %v4544_v53 = vld [vmem:[#allocation13_spill] sm:$0xff] }
 0x11b   : > { %1165 = vrot.lane.b32.xlu1 %v3147_v31, %s2793_s21  ;;  %1195 = vrot.lane.b32.xlu0 %v3256_v16, %s2793_s21 }
 0x11d   : > { %v790_v32 = vpop.permute.xlu1 %789  ;;  %v788_v44 = vpop.permute.xlu0 %787 }
 0x11e   : > { %v3586_v60 = vsel %vm1577_vm2, %v3337_v36, %v790_v32  ;;  %v3590_v9 = vsel %vm1577_vm2, %v3340_v39, %v788_v44 }
 0x11f   : > { %1291 = vrot.lane.b32.xlu1 %v2909_v7, %s2794_s12  ;;  %1197 = vrot.lane.b32.xlu0 %v3253_v62, %s2793_s21 }
 0x121   : > { %v794_v31 = vpop.permute.xlu1 %793  ;;  %v792_v57 = vpop.permute.xlu0 %791 }
 0x122   : > { %v3598_v16 = vsel %vm1577_vm2, %v3359_v0, %v794_v31  ;;  %v3602_v36 = vsel %vm1577_vm2, %v3362_v25, %v792_v57  ;;  %v4537_v25 = vld [vmem:[#allocation6_spill] sm:$0xff] }
 0x123   : > { %943 = vrot.lane.b32.xlu1 %v4535_v50, %s2791_s10  ;;  %1323 = vrot.lane.b32.xlu0 %v4535_v50, %s2794_s12 }
 0x125   : > { %v798_v7 = vpop.permute.xlu1 %797  ;;  %v796_v39 = vpop.permute.xlu0 %795 }
 0x126   : > { %v3610_v62 = vsel %vm1577_vm2, %v3381_v52, %v798_v7  ;;  %v3614_v0 = vsel %vm1577_vm2, %v3384_v55, %v796_v39  ;;  %v4540_v55 = vld [vmem:[#allocation14_spill] sm:$0xff] }
 0x127   : > { %1325 = vrot.lane.b32.xlu1 %v4536_v4, %s2794_s12  ;;  %1293 = vrot.lane.b32.xlu0 %v4537_v25, %s2794_s12 }
 0x129   : > { %v802_v33 = vpop.permute.xlu1 %801  ;;  %v800_v14 = vpop.permute.xlu0 %799 }
 0x12a   : > { %v3622_v26 = vsel %vm1577_vm2, %v3398_v19, %v802_v33  ;;  %v3626_v52 = vsel %vm1577_vm2, %v3402_v17, %v800_v14 }
 0x12b   : > { %4538 = vst [vmem:[#allocation40_spill] sm:$0xff] %v3622_v26  ;;  %1451 = vrot.lane.b32.xlu1 %v4539_v24, %s2795_s23  ;;  %1419 = vrot.lane.b32.xlu0 %v4540_v55, %s2795_s23  ;;  %v2403_v26 = vld [vmem:[%s2879_s6 + $0x81] sm:$0xff] }
 0x12d   : > { %v806_v61 = vpop.permute.xlu1 %805  ;;  %v804_v48 = vpop.permute.xlu0 %803 }
 0x12e   : > { %v3634_v40 = vsel %vm1577_vm2, %v3416_v35, %v806_v61  ;;  %v3638_v19 = vsel %vm1577_vm2, %v3420_v18, %v804_v48  ;;  %v4549_v48 = vld [vmem:[#allocation10_spill] sm:$0xff] }
 0x12f   : > { %4541 = vst [vmem:[#allocation36_spill] sm:$0xff] %v3634_v40  ;;  %4542 = vst [vmem:[#allocation37_spill] sm:$0xff] %v3638_v19  ;;  %945 = vrot.lane.b32.xlu1 %v4536_v4, %s2791_s10  ;;  %913 = vrot.lane.b32.xlu0 %v4537_v25, %s2791_s10  ;;  %v4546_v25 = vld [vmem:[#allocation7_spill] sm:$0xff] }
 0x130   : > { %v4557_v40 = vld [vmem:[#allocation39_spill] sm:$0xff] }
 0x131   : > { %v3644_v17 = vpop.permute.xlu1 %809  ;;  %v3646_v3 = vpop.permute.xlu0 %807 }
 0x133   : > { %1071 = vrot.lane.b32.xlu1 %v4539_v24, %s2792_s5  ;;  %1039 = vrot.lane.b32.xlu0 %v4540_v55, %s2792_s5 }
 0x135   : > { %v3652_v35 = vpop.permute.xlu1 %813  ;;  %v3654_v18 = vpop.permute.xlu0 %811 }
 0x137   : > { %1453 = vrot.lane.b32.xlu1 %v4543_v20, %s2795_s23  ;;  %1421 = vrot.lane.b32.xlu0 %v4544_v53, %s2795_s23 }
 0x139   : > { %v818_v22 = vpop.permute.xlu1 %817  ;;  %v816_v32 = vpop.permute.xlu0 %815 }
 0x13a   : > { %v3662_v44 = vsel %vm1577_vm2, %v3464_v1, %v818_v22  ;;  %v3666_v31 = vsel %vm1577_vm2, %v3468_v47, %v816_v32  ;;  %v4551_v22 = vld [vmem:[#allocation16_spill] sm:$0xff] }
 0x13b   : > { %1073 = vrot.lane.b32.xlu1 %v4543_v20, %s2792_s5  ;;  %1041 = vrot.lane.b32.xlu0 %v4544_v53, %s2792_s5  ;;  %v4550_v53 = vld [vmem:[#allocation21_spill] sm:$0xff] }
 0x13d   : > { %v822_v57 = vpop.permute.xlu1 %821  ;;  %v820_v50 = vpop.permute.xlu0 %819 }
 0x13e   : > { %v3674_v7 = vsel %vm1577_vm2, %v3487_v11, %v822_v57  ;;  %v3678_v1 = vsel %vm1577_vm2, %v3490_v49, %v820_v50 }
 0x13f   : > { %1199 = vrot.lane.b32.xlu1 %v3270_v41, %s2793_s21  ;;  %1167 = vrot.lane.b32.xlu0 %v3162_v46, %s2793_s21 }
 0x141   : > { %v826_v47 = vpop.permute.xlu1 %825  ;;  %v824_v39 = vpop.permute.xlu0 %823 }
 0x142   : > { %v3686_v4 = vsel %vm1577_vm2, %v3503_v51, %v826_v47  ;;  %v3690_v11 = vsel %vm1577_vm2, %v3506_v2, %v824_v39  ;;  %v4545_v2 = vld [vmem:[#allocation11_spill] sm:$0xff]  ;;  %v4552_v39 = vld [vmem:[#allocation20_spill] sm:$0xff] }
 0x143   : > { %1201 = vrot.lane.b32.xlu1 %v3267_v56, %s2793_s21  ;;  %1169 = vrot.lane.b32.xlu0 %v3159_v45, %s2793_s21  ;;  %v2306_v56 = vld [vmem:[%s2879_s6 + $0x61] sm:$0xff] }
 0x145   : > { %v830_v41 = vpop.permute.xlu1 %829  ;;  %v828_v49 = vpop.permute.xlu0 %827 }
 0x146   : > { %v3698_v46 = vsel %vm1577_vm2, %v3519_v28, %v830_v41  ;;  %v3702_v51 = vsel %vm1577_vm2, %v3522_v13, %v828_v49  ;;  %v2401_v13 = vld [vmem:[%s2879_s6 + $0x69] sm:$0xff] }
 0x147   : > { %1327 = vrot.lane.b32.xlu1 %v4545_v2, %s2794_s12  ;;  %1295 = vrot.lane.b32.xlu0 %v4546_v25, %s2794_s12  ;;  %v4553_v41 = vld [vmem:[#allocation15_spill] sm:$0xff] }
 0x149   : > { %v834_v33 = vpop.permute.xlu1 %833  ;;  %v832_v14 = vpop.permute.xlu0 %831 }
 0x14a   : > { %v3711_v45 = vsel %vm1577_vm2, %v3535_v27, %v834_v33  ;;  %v3715_v28 = vsel %vm1577_vm2, %v3538_v15, %v832_v14 }
 0x14b   : > { %947 = vrot.lane.b32.xlu1 %v4545_v2, %s2791_s10  ;;  %915 = vrot.lane.b32.xlu0 %v2306_v56, %s2791_s10 }
 0x14d   : > { %v838_v24 = vpop.permute.xlu1 %837  ;;  %v836_v55 = vpop.permute.xlu0 %835 }
 0x14e   : > { %v3723_v61 = vsel %vm1577_vm2, %v3546_v42, %v838_v24  ;;  %v3727_v27 = vsel %vm1577_vm2, %v3550_v5, %v836_v55  ;;  %v2402_v24 = vld [vmem:[%s2879_s6 + $0x79] sm:$0xff] }
 0x14f   : > { %4547 = vst [vmem:[#allocation12_spill] sm:$0xff] %v3723_v61  ;;  %4548 = vst [vmem:[#allocation17_spill] sm:$0xff] %v3727_v27  ;;  %1329 = vrot.lane.b32.xlu1 %v4549_v48, %s2794_s12  ;;  %1297 = vrot.lane.b32.xlu0 %v2401_v13, %s2794_s12  ;;  %v2419_v27 = vld [vmem:[%s2879_s6 + $0x141] sm:$0xff] }
 0x151   : > { %v3732_v15 = vpop.permute.xlu1 %905  ;;  %v904_v20 = vpop.permute.xlu0 %903 }
 0x153   : > { %1455 = vrot.lane.b32.xlu1 %v4550_v53, %s2795_s23  ;;  %1423 = vrot.lane.b32.xlu0 %v4551_v22, %s2795_s23 }
 0x155   : > { %v3738_v42 = vpop.permute.xlu1 %909  ;;  %v3740_v32 = vpop.permute.xlu0 %907 }
 0x157   : > { %949 = vrot.lane.b32.xlu1 %v4549_v48, %s2791_s10  ;;  %917 = vrot.lane.b32.xlu0 %v2401_v13, %s2791_s10  ;;  %v2418_v13 = vld [vmem:[%s2879_s6 + $0x139] sm:$0xff] }
 0x159   : > { %v936_v5 = vpop.permute.xlu1 %935  ;;  %v3745_v57 = vpop.permute.xlu0 %911 }
 0x15b   : > { %1075 = vrot.lane.b32.xlu1 %v4550_v53, %s2792_s5  ;;  %1043 = vrot.lane.b32.xlu0 %v4551_v22, %s2792_s5  ;;  %v4554_v22 = vld [vmem:[#allocation23_spill] sm:$0xff] }
 0x15d   : > { %v1032_v50 = vpop.permute.xlu1 %1031  ;;  %v3751_v47 = vpop.permute.xlu0 %937 }
 0x15f   : > { %1457 = vrot.lane.b32.xlu1 %v4552_v39, %s2795_s23  ;;  %1425 = vrot.lane.b32.xlu0 %v4553_v41, %s2795_s23 }
 0x161   : > { %v3757_v49 = vpop.permute.xlu1 %1033  ;;  %v1064_v2 = vpop.permute.xlu0 %1063 }
 0x163   : > { %1077 = vrot.lane.b32.xlu1 %v4552_v39, %s2792_s5  ;;  %1045 = vrot.lane.b32.xlu0 %v4553_v41, %s2792_s5  ;;  %v4555_v39 = vld [vmem:[#allocation29_spill] sm:$0xff] }
 0x165   : > { %v1160_v25 = vpop.permute.xlu1 %1159  ;;  %v3763_v56 = vpop.permute.xlu0 %1065 }
 0x167   : > { %1203 = vrot.lane.b32.xlu1 %v3282_v54, %s2793_s21  ;;  %1171 = vrot.lane.b32.xlu0 %v3180_v8, %s2793_s21  ;;  %v197_v54 = vld [vmem:[%s2879_s6] sm:$0xff] }
 0x169   : > { %v3769_v33 = vpop.permute.xlu1 %1161  ;;  %v1192_v14 = vpop.permute.xlu0 %1191 }
 0x16b   : > { %1205 = vrot.lane.b32.xlu1 %v3279_v38, %s2793_s21  ;;  %1173 = vrot.lane.b32.xlu0 %v3177_v63, %s2793_s21  ;;  %v1512_v38 = vsel %vm1511_vm0, %v197_v54, %v4554_v22  ;;  %v4556_v63 = vld [vmem:[#allocation33_spill] sm:$0xff] }
 0x16c   : > { %v1528_v41 = vsel %vm1511_vm0, %v4556_v63, %v4555_v39  ;;  %v1545_v61 = vsel %vm1544_vm1, %v1512_v38, %v4557_v40  ;;  %v2434_v63 = vld [vmem:[%s2879_s6 + $0x7a] sm:$0xff] }
 0x16d   : > { %v1288_v55 = vpop.permute.xlu1 %1287  ;;  %v3777_v48 = vpop.permute.xlu0 %1193  ;;  %v1561_v19 = vsel %vm1544_vm1, %v1528_v41, %v3434_v43  ;;  %v1578_v54 = vsel %vm1577_vm2, %v1545_v61, %v3558_v12  ;;  %v198_v12 = vld [vmem:[%s2879_s6 + $0x8] sm:$0xff]  ;;  %v2450_v61 = vld [vmem:[%s2879_s6 + $0x13a] sm:$0xff] }
 0x16e   : > { %v1594_v22 = vsel %vm1577_vm2, %v1561_v19, %v3646_v3  ;;  %v1611_v40 = vsel %vm1610_vm3, %v1578_v54, %v904_v20 }
 0x16f   : > { %1331 = vrot.lane.b32.xlu1 %v2418_v13, %s2794_s12  ;;  %1299 = vrot.lane.b32.xlu0 %v2402_v24, %s2794_s12  ;;  %v1627_v38 = vsel %vm1610_vm3, %v1594_v22, %v936_v5  ;;  %v1644_v43 = vsel %vm1643_vm4, %v1611_v40, %v1032_v50  ;;  %v4558_v22 = vld [vmem:[#allocation25_spill] sm:$0xff] }
 0x170   : > { %v1660_v39 = vsel %vm1643_vm4, %v1627_v38, %v1064_v2  ;;  %v1677_v19 = vsel %vm1676_vm5, %v1644_v43, %v1160_v25  ;;  %v1513_v40 = vsel %vm1511_vm0, %v198_v12, %v4558_v22  ;;  %v4559_v25 = vld [vmem:[#allocation38_spill] sm:$0xff]  ;;  %v4561_v12 = vld [vmem:[#allocation32_spill] sm:$0xff]  ;;  %v2373_v22 = vld [vmem:[%s2879_s6 + $0x98] sm:$0xff] }
 0x171   : > { %v3782_v8 = vpop.permute.xlu1 %939  ;;  %v1320_v53 = vpop.permute.xlu0 %1319  ;;  %v1693_v3 = vsel %vm1676_vm5, %v1660_v39, %v1192_v14  ;;  %v1710_v20 = vsel %vm1709_vm6, %v1677_v19, %v1288_v55  ;;  %v1546_v14 = vsel %vm1544_vm1, %v1513_v40, %v4559_v25  ;;  %v4560_v39 = vld [vmem:[#allocation28_spill] sm:$0xff] }
 0x172   : > { %v1726_v5 = vsel %vm1709_vm6, %v1693_v3, %v1320_v53  ;;  %v1579_v55 = vsel %vm1577_vm2, %v1546_v14, %v3556_v37  ;;  %v1529_v19 = vsel %vm1511_vm0, %v4561_v12, %v4560_v39  ;;  %v2420_v14 = vld [vmem:[%s2879_s6 + $0x151] sm:$0xff]  ;;  %v4562_v12 = vld [vmem:[#allocation22_spill] sm:$0xff] }
 0x173   : > { %951 = vrot.lane.b32.xlu1 %v2418_v13, %s2791_s10  ;;  %919 = vrot.lane.b32.xlu0 %v2402_v24, %s2791_s10  ;;  %v1612_v43 = vsel %vm1610_vm3, %v1579_v55, %v3732_v15  ;;  %v1562_v37 = vsel %vm1544_vm1, %v1529_v19, %v3432_v6  ;;  %v2404_v55 = vld [vmem:[%s2879_s6 + $0x91] sm:$0xff]  ;;  %v4563_v19 = vld [vmem:[#allocation26_spill] sm:$0xff] }
 0x174   : > { %v1645_v3 = vsel %vm1643_vm4, %v1612_v43, %v3757_v49  ;;  %v1595_v15 = vsel %vm1577_vm2, %v1562_v37, %v3644_v17  ;;  %v2451_v17 = vld [vmem:[%s2879_s6 + $0x142] sm:$0xff] }
 0x175   : > { %v1322_v13 = vpop.permute.xlu1 %1321  ;;  %v1290_v24 = vpop.permute.xlu0 %1289  ;;  %v1628_v49 = vsel %vm1610_vm3, %v1595_v15, %v3751_v47  ;;  %v4565_v37 = vld [vmem:[#allocation35_spill] sm:$0xff] }
 0x177   : > { %1333 = vrot.lane.b32.xlu1 %v2419_v27, %s2794_s12  ;;  %1301 = vrot.lane.b32.xlu0 %v2403_v26, %s2794_s12 }
 0x179   : > { %v1448_v41 = vpop.permute.xlu1 %1447  ;;  %v1416_v50 = vpop.permute.xlu0 %1415 }
 0x17a   : > { %v1743_v2 = vsel %vm1742_vm7, %v1710_v20, %v1416_v50  ;;  %v1759_v54 = vsel %vm1742_vm7, %v1726_v5, %v1448_v41  ;;  %v1678_v20 = vsel %vm1676_vm5, %v1645_v3, %v3769_v33  ;;  %v2435_v33 = vld [vmem:[%s2879_s6 + $0x82] sm:$0xff]  ;;  %v1514_v3 = vsel %vm1511_vm0, %v4563_v19, %v4562_v12 }
 0x17b   : > { %1459 = vrot.lane.b32.xlu1 %v2450_v61, %s2795_s23  ;;  %1427 = vrot.lane.b32.xlu0 %v2434_v63, %s2795_s23  ;;  %v1711_v5 = vsel %vm1709_vm6, %v1678_v20, %v1290_v24  ;;  %v4569_v12 = vld [vmem:[#allocation30_spill] sm:$0xff] }
 0x17c   : > { %2579 = vmatprep.mubr.msk.f32.mxu0 %vm1775_vm8, %v1743_v2  ;;  %2603 = vmatprep.mubr.msk.f32.mxu1 %vm1775_vm8, %v1759_v54  ;;  %v4570_v19 = vld [vmem:[#allocation34_spill] sm:$0xff] }
 0x17d   : > { %v1036_v53 = vpop.permute.xlu1 %1035  ;;  %v3826_v38 = vpop.permute.xlu0 %941 }
 0x17f   : > { %953 = vrot.lane.b32.xlu1 %v2419_v27, %s2791_s10  ;;  %921 = vrot.lane.b32.xlu0 %v2403_v26, %s2791_s10  ;;  %v1661_v26 = vsel %vm1643_vm4, %v1628_v49, %v3763_v56 }
 0x180   : > { %v1694_v6 = vsel %vm1676_vm5, %v1661_v26, %v3777_v48 }
 0x181   : > { %v1418_v41 = vpop.permute.xlu1 %1417  ;;  %v1068_v50 = vpop.permute.xlu0 %1067  ;;  %v1727_v24 = vsel %vm1709_vm6, %v1694_v6, %v1322_v13  ;;  %v2372_v13 = vld [vmem:[%s2879_s6 + $0x90] sm:$0xff] }
 0x182   : > { %v1744_v27 = vsel %vm1742_vm7, %v1711_v5, %v1418_v41 }
 0x183   : > { %1079 = vrot.lane.b32.xlu1 %v2450_v61, %s2792_s5  ;;  %1047 = vrot.lane.b32.xlu0 %v2434_v63, %s2792_s5 }
 0x184   : > { %2580 = vmatmul.mubr.msk.f32.vlgmr.msra.gmra.mrb[0].mxu0 %vm1775_vm8, %v1744_v27 }
 0x185   : > { %v3857_v47 = vpop.permute.xlu1 %1037  ;;  %v1450_v2 = vpop.permute.xlu0 %1449 }
 0x186   : > { %v1760_v56 = vsel %vm1742_vm7, %v1727_v24, %v1450_v2  ;;  %v2405_v2 = vld [vmem:[%s2879_s6 + $0x99] sm:$0xff] }
 0x187   : > { %1461 = vrot.lane.b32.xlu1 %v2451_v17, %s2795_s23  ;;  %1429 = vrot.lane.b32.xlu0 %v2435_v33, %s2795_s23 }
 0x188   : > { %2604 = vmatmul.mubr.msk.f32.vlgmr.msra.gmra.mrb[0].mxu1 %vm1775_vm8, %v1760_v56 }
 0x189   : > { %v1164_v48 = vpop.permute.xlu1 %1163  ;;  %v3863_v61 = vpop.permute.xlu0 %1069 }
 0x18b   : > { %1081 = vrot.lane.b32.xlu1 %v2451_v17, %s2792_s5  ;;  %1049 = vrot.lane.b32.xlu0 %v2435_v33, %s2792_s5 }
 0x18d   : > { %v3868_v63 = vpop.permute.xlu1 %1165  ;;  %v1196_v54 = vpop.permute.xlu0 %1195 }
 0x18f   : > { %1207 = vrot.lane.b32.xlu1 %v4530_v59, %s2793_s21  ;;  %1175 = vrot.lane.b32.xlu0 %v2372_v13, %s2793_s21  ;;  %v4564_v59 = vld [vmem:[#allocation31_spill] sm:$0xff] }
 0x190   : > { %v1530_v20 = vsel %vm1511_vm0, %v4565_v37, %v4564_v59  ;;  %v4571_v59 = vld [vmem:[#allocation41_spill] sm:$0xff] }
 0x191   : > { %v1292_v40 = vpop.permute.xlu1 %1291  ;;  %v1198_v25 = vpop.permute.xlu0 %1197  ;;  %v1563_v5 = vsel %vm1544_vm1, %v1530_v20, %v3448_v30 }
 0x192   : > { %v1596_v49 = vsel %vm1577_vm2, %v1563_v5, %v3654_v18  ;;  %v2421_v18 = vld [vmem:[%s2879_s6 + $0x159] sm:$0xff] }
 0x193   : > { %1209 = vrot.lane.b32.xlu1 %v3299_v23, %s2793_s21  ;;  %1177 = vrot.lane.b32.xlu0 %v2373_v22, %s2793_s21  ;;  %v4566_v23 = vld [vmem:[#allocation42_spill] sm:$0xff]  ;;  %v1629_v17 = vsel %vm1610_vm3, %v1596_v49, %v3782_v8 }
 0x194   : > { %v1547_v15 = vsel %vm1544_vm1, %v1514_v3, %v4566_v23  ;;  %v1662_v24 = vsel %vm1643_vm4, %v1629_v17, %v1068_v50  ;;  %v1531_v3 = vsel %vm1511_vm0, %v4570_v19, %v4569_v12  ;;  %v1615_v19 = vsel %vm1610_vm3, %v3578_v21, %v3745_v57  ;;  %v2407_v21 = vld [vmem:[%s2879_s6 + $0xb1] sm:$0xff] }
 0x195   : > { %v3879_v43 = vpop.permute.xlu1 %943  ;;  %v1324_v39 = vpop.permute.xlu0 %1323  ;;  %v1580_v41 = vsel %vm1577_vm2, %v1547_v15, %v3566_v10  ;;  %v1695_v10 = vsel %vm1676_vm5, %v1662_v24, %v1196_v54  ;;  %v2436_v54 = vld [vmem:[%s2879_s6 + $0x92] sm:$0xff]  ;;  %v1564_v20 = vsel %vm1544_vm1, %v1531_v3, %v3446_v29 }
 0x196   : > { %v1613_v6 = vsel %vm1610_vm3, %v1580_v41, %v3740_v32  ;;  %v1728_v8 = vsel %vm1709_vm6, %v1695_v10, %v1324_v39  ;;  %v1597_v15 = vsel %vm1577_vm2, %v1564_v20, %v3652_v35  ;;  %v1631_v3 = vsel %vm1610_vm3, %v3666_v31, %v3879_v43 }
 0x197   : > { %1335 = vrot.lane.b32.xlu1 %v2420_v14, %s2794_s12  ;;  %1303 = vrot.lane.b32.xlu0 %v2404_v55, %s2794_s12  ;;  %v1646_v33 = vsel %vm1643_vm4, %v1613_v6, %v1036_v53  ;;  %v1630_v6 = vsel %vm1610_vm3, %v1597_v15, %v3826_v38  ;;  %v2423_v15 = vld [vmem:[%s2879_s6 + $0x171] sm:$0xff] }
 0x198   : > { %v1679_v30 = vsel %vm1676_vm5, %v1646_v33, %v1164_v48  ;;  %v2452_v48 = vld [vmem:[%s2879_s6 + $0x152] sm:$0xff]  ;;  %v1663_v29 = vsel %vm1643_vm4, %v1630_v6, %v3863_v61  ;;  %v2454_v6 = vld [vmem:[%s2879_s6 + $0x16a] sm:$0xff] }
 0x199   : > { %v1326_v27 = vpop.permute.xlu1 %1325  ;;  %v1294_v26 = vpop.permute.xlu0 %1293  ;;  %v1712_v32 = vsel %vm1709_vm6, %v1679_v30, %v1292_v40  ;;  %v1696_v35 = vsel %vm1676_vm5, %v1663_v29, %v1198_v25  ;;  %v2437_v25 = vld [vmem:[%s2879_s6 + $0x9a] sm:$0xff] }
 0x19b   : > { %955 = vrot.lane.b32.xlu1 %v2420_v14, %s2791_s10  ;;  %923 = vrot.lane.b32.xlu0 %v2404_v55, %s2791_s10  ;;  %v4567_v14 = vld [vmem:[#allocation24_spill] sm:$0xff]  ;;  %v4568_v55 = vld [vmem:[#allocation27_spill] sm:$0xff] }
 0x19c   : > { %v1515_v39 = vsel %vm1511_vm0, %v4568_v55, %v4567_v14 }
 0x19d   : > { %v1452_v56 = vpop.permute.xlu1 %1451  ;;  %v1420_v53 = vpop.permute.xlu0 %1419  ;;  %v1548_v37 = vsel %vm1544_vm1, %v1515_v39, %v4571_v59 }
 0x19e   : > { %v1761_v50 = vsel %vm1742_vm7, %v1728_v8, %v1452_v56  ;;  %v1745_v13 = vsel %vm1742_vm7, %v1712_v32, %v1420_v53  ;;  %v1581_v23 = vsel %vm1577_vm2, %v1548_v37, %v3564_v58  ;;  %v2391_v56 = vld [vmem:[%s2879_s6 + $0x170] sm:$0xff] }
 0x19f   : > { %1337 = vrot.lane.b32.xlu1 %v2421_v18, %s2794_s12  ;;  %1305 = vrot.lane.b32.xlu0 %v2405_v2, %s2794_s12  ;;  %v1614_v49 = vsel %vm1610_vm3, %v1581_v23, %v3738_v42  ;;  %v1729_v42 = vsel %vm1709_vm6, %v1696_v35, %v1326_v27  ;;  %v2375_v53 = vld [vmem:[%s2879_s6 + $0xb0] sm:$0xff] }
 0x1a0   : > { %2582 = vmatprep.mubr.msk.f32.mxu0 %vm1775_vm8, %v1745_v13  ;;  %2606 = vmatprep.mubr.msk.f32.mxu1 %vm1775_vm8, %v1761_v50  ;;  %v1647_v17 = vsel %vm1643_vm4, %v1614_v49, %v3857_v47 }
 0x1a1   : > { %v3919_v22 = vpop.permute.xlu1 %945  ;;  %v3921_v40 = vpop.permute.xlu0 %913  ;;  %v1680_v58 = vsel %vm1676_vm5, %v1647_v17, %v3868_v63  ;;  %v2453_v63 = vld [vmem:[%s2879_s6 + $0x15a] sm:$0xff]  ;;  %v2438_v17 = vld [vmem:[%s2879_s6 + $0xaa] sm:$0xff] }
 0x1a2   : > { %v1713_v38 = vsel %vm1709_vm6, %v1680_v58, %v1294_v26 }
 0x1a3   : > { %1463 = vrot.lane.b32.xlu1 %v2452_v48, %s2795_s23  ;;  %1431 = vrot.lane.b32.xlu0 %v2436_v54, %s2795_s23 }
 0x1a5   : > { %v1072_v5 = vpop.permute.xlu1 %1071  ;;  %v1040_v41 = vpop.permute.xlu0 %1039 }
 0x1a6   : > { %v1664_v59 = vsel %vm1643_vm4, %v1631_v3, %v1072_v5  ;;  %v1648_v37 = vsel %vm1643_vm4, %v1615_v19, %v1040_v41  ;;  %v2408_v19 = vld [vmem:[%s2879_s6 + $0xc1] sm:$0xff] }
 0x1a7   : > { %957 = vrot.lane.b32.xlu1 %v2421_v18, %s2791_s10  ;;  %925 = vrot.lane.b32.xlu0 %v2405_v2, %s2791_s10  ;;  %v2390_v18 = vld [vmem:[%s2879_s6 + $0x168] sm:$0xff] }
 0x1a8   : > { %v2374_v2 = vld [vmem:[%s2879_s6 + $0xa8] sm:$0xff] }
 0x1a9   : > { %v1454_v33 = vpop.permute.xlu1 %1453  ;;  %v1422_v47 = vpop.permute.xlu0 %1421 }
 0x1aa   : > { %v1762_v24 = vsel %vm1742_vm7, %v1729_v42, %v1454_v33  ;;  %v1746_v61 = vsel %vm1742_vm7, %v1713_v38, %v1422_v47  ;;  %v1632_v38 = vsel %vm1610_vm3, %v3662_v44, %v3919_v22  ;;  %v1616_v33 = vsel %vm1610_vm3, %v3574_v34, %v3921_v40 }
 0x1ab   : > { %1083 = vrot.lane.b32.xlu1 %v2452_v48, %s2792_s5  ;;  %1051 = vrot.lane.b32.xlu0 %v2436_v54, %s2792_s5  ;;  %v2422_v48 = vld [vmem:[%s2879_s6 + $0x169] sm:$0xff] }
 0x1ac   : > { %2583 = vmatmul.mubr.msk.f32.gmra.mrb[2].mxu0 %vm1775_vm8, %v1746_v61  ;;  %2607 = vmatmul.mubr.msk.f32.gmra.mrb[2].mxu1 %vm1775_vm8, %v1762_v24  ;;  %v2406_v54 = vld [vmem:[%s2879_s6 + $0xa9] sm:$0xff] }
 0x1ad   : > { %v1074_v27 = vpop.permute.xlu1 %1073  ;;  %v1042_v26 = vpop.permute.xlu0 %1041 }
 0x1ae   : > { %v1665_v47 = vsel %vm1643_vm4, %v1632_v38, %v1074_v27  ;;  %v1649_v24 = vsel %vm1643_vm4, %v1616_v33, %v1042_v26  ;;  %v2455_v26 = vld [vmem:[%s2879_s6 + $0x172] sm:$0xff] }
 0x1af   : > { %1465 = vrot.lane.b32.xlu1 %v2453_v63, %s2795_s23  ;;  %1433 = vrot.lane.b32.xlu0 %v2437_v25, %s2795_s23 }
 0x1b1   : > { %v1200_v30 = vpop.permute.xlu1 %1199  ;;  %v1168_v10 = vpop.permute.xlu0 %1167 }
 0x1b2   : > { %v1697_v20 = vsel %vm1676_vm5, %v1664_v59, %v1200_v30  ;;  %v1681_v23 = vsel %vm1676_vm5, %v1648_v37, %v1168_v10  ;;  %v2439_v30 = vld [vmem:[%s2879_s6 + $0xb2] sm:$0xff] }
 0x1b3   : > { %1085 = vrot.lane.b32.xlu1 %v2453_v63, %s2792_s5  ;;  %1053 = vrot.lane.b32.xlu0 %v2437_v25, %s2792_s5 }
 0x1b5   : > { %v1202_v32 = vpop.permute.xlu1 %1201  ;;  %v1170_v8 = vpop.permute.xlu0 %1169 }
 0x1b6   : > { %v1698_v61 = vsel %vm1676_vm5, %v1665_v47, %v1202_v32  ;;  %v1682_v63 = vsel %vm1676_vm5, %v1649_v24, %v1170_v8  ;;  %v2392_v8 = vld [vmem:[%s2879_s6 + $0x180] sm:$0xff] }
 0x1b7   : > { %1211 = vrot.lane.b32.xlu1 %v2390_v18, %s2793_s21  ;;  %1179 = vrot.lane.b32.xlu0 %v2374_v2, %s2793_s21 }
 0x1b9   : > { %v1328_v50 = vpop.permute.xlu1 %1327  ;;  %v1296_v13 = vpop.permute.xlu0 %1295 }
 0x1ba   : > { %v1730_v57 = vsel %vm1709_vm6, %v1697_v20, %v1328_v50  ;;  %v1714_v31 = vsel %vm1709_vm6, %v1681_v23, %v1296_v13  ;;  %v2393_v13 = vld [vmem:[%s2879_s6 + $0x188] sm:$0xff] }
 0x1bb   : > { %1213 = vrot.lane.b32.xlu1 %v2391_v56, %s2793_s21  ;;  %1181 = vrot.lane.b32.xlu0 %v2375_v53, %s2793_s21  ;;  %v2376_v56 = vld [vmem:[%s2879_s6 + $0xc0] sm:$0xff] }
 0x1bd   : > { %v3976_v14 = vpop.permute.xlu1 %947  ;;  %v3978_v55 = vpop.permute.xlu0 %915 }
 0x1be   : > { %v1633_v23 = vsel %vm1610_vm3, %v3678_v1, %v3976_v14  ;;  %v2409_v1 = vld [vmem:[%s2879_s6 + $0xc9] sm:$0xff] }
 0x1bf   : > { %1339 = vrot.lane.b32.xlu1 %v2422_v48, %s2794_s12  ;;  %1307 = vrot.lane.b32.xlu0 %v2406_v54, %s2794_s12 }
 0x1c1   : > { %v1330_v39 = vpop.permute.xlu1 %1329  ;;  %v1298_v12 = vpop.permute.xlu0 %1297 }
 0x1c2   : > { %v1731_v44 = vsel %vm1709_vm6, %v1698_v61, %v1330_v39  ;;  %v1715_v22 = vsel %vm1709_vm6, %v1682_v63, %v1298_v12  ;;  %v2424_v12 = vld [vmem:[%s2879_s6 + $0x181] sm:$0xff] }
 0x1c3   : > { %959 = vrot.lane.b32.xlu1 %v2422_v48, %s2791_s10  ;;  %927 = vrot.lane.b32.xlu0 %v2406_v54, %s2791_s10  ;;  %v2377_v48 = vld [vmem:[%s2879_s6 + $0xc8] sm:$0xff] }
 0x1c5   : > { %v1456_v43 = vpop.permute.xlu1 %1455  ;;  %v1424_v5 = vpop.permute.xlu0 %1423 }
 0x1c6   : > { %v1763_v41 = vsel %vm1742_vm7, %v1730_v57, %v1456_v43  ;;  %v1747_v49 = vsel %vm1742_vm7, %v1714_v31, %v1424_v5  ;;  %v2425_v5 = vld [vmem:[%s2879_s6 + $0x189] sm:$0xff] }
 0x1c7   : > { %1341 = vrot.lane.b32.xlu1 %v2423_v15, %s2794_s12  ;;  %1309 = vrot.lane.b32.xlu0 %v2407_v21, %s2794_s12 }
 0x1c8   : > { %2585 = vmatprep.mubr.msk.f32.mxu0 %vm1775_vm8, %v1747_v49  ;;  %2609 = vmatprep.mubr.msk.f32.mxu1 %vm1775_vm8, %v1763_v41 }
 0x1c9   : > { %v4006_v29 = vpop.permute.xlu1 %949  ;;  %v4008_v58 = vpop.permute.xlu0 %917 }
 0x1ca   : > { %v1634_v24 = vsel %vm1610_vm3, %v3674_v7, %v4006_v29  ;;  %v1618_v61 = vsel %vm1610_vm3, %v3586_v60, %v4008_v58 }
 0x1cb   : > { %1467 = vrot.lane.b32.xlu1 %v2454_v6, %s2795_s23  ;;  %1435 = vrot.lane.b32.xlu0 %v2438_v17, %s2795_s23 }
 0x1cd   : > { %v1076_v35 = vpop.permute.xlu1 %1075  ;;  %v1044_v42 = vpop.permute.xlu0 %1043 }
 0x1cf   : > { %961 = vrot.lane.b32.xlu1 %v2423_v15, %s2791_s10  ;;  %929 = vrot.lane.b32.xlu0 %v2407_v21, %s2791_s10  ;;  %v1617_v15 = vsel %vm1610_vm3, %v3590_v9, %v3978_v55  ;;  %v1666_v21 = vsel %vm1643_vm4, %v1633_v23, %v1076_v35  ;;  %v2440_v35 = vld [vmem:[%s2879_s6 + $0xc2] sm:$0xff] }
 0x1d0   : > { %v1650_v57 = vsel %vm1643_vm4, %v1617_v15, %v1044_v42  ;;  %v2411_v23 = vld [vmem:[%s2879_s6 + $0xe1] sm:$0xff] }
 0x1d1   : > { %v1458_v25 = vpop.permute.xlu1 %1457  ;;  %v1426_v34 = vpop.permute.xlu0 %1425 }
 0x1d2   : > { %v1764_v40 = vsel %vm1742_vm7, %v1731_v44, %v1458_v25  ;;  %v1748_v27 = vsel %vm1742_vm7, %v1715_v22, %v1426_v34 }
 0x1d3   : > { %1087 = vrot.lane.b32.xlu1 %v2454_v6, %s2792_s5  ;;  %1055 = vrot.lane.b32.xlu0 %v2438_v17, %s2792_s5  ;;  %v2456_v17 = vld [vmem:[%s2879_s6 + $0x182] sm:$0xff] }
 0x1d4   : > { %2586 = vmatmul.mubr.msk.f32.gmra.mrb[4].mxu0 %vm1775_vm8, %v1748_v27  ;;  %2610 = vmatmul.mubr.msk.f32.gmra.mrb[4].mxu1 %vm1775_vm8, %v1764_v40  ;;  %v2457_v27 = vld [vmem:[%s2879_s6 + $0x18a] sm:$0xff] }
 0x1d5   : > { %v1078_v10 = vpop.permute.xlu1 %1077  ;;  %v1046_v18 = vpop.permute.xlu0 %1045 }
 0x1d6   : > { %v1667_v63 = vsel %vm1643_vm4, %v1634_v24, %v1078_v10  ;;  %v1651_v44 = vsel %vm1643_vm4, %v1618_v61, %v1046_v18 }
 0x1d7   : > { %1469 = vrot.lane.b32.xlu1 %v2455_v26, %s2795_s23  ;;  %1437 = vrot.lane.b32.xlu0 %v2439_v30, %s2795_s23 }
 0x1d9   : > { %v1204_v2 = vpop.permute.xlu1 %1203  ;;  %v1172_v32 = vpop.permute.xlu0 %1171 }
 0x1da   : > { %v1699_v31 = vsel %vm1676_vm5, %v1666_v21, %v1204_v2  ;;  %v1683_v43 = vsel %vm1676_vm5, %v1650_v57, %v1172_v32  ;;  %v2394_v32 = vld [vmem:[%s2879_s6 + $0x198] sm:$0xff] }
 0x1db   : > { %1089 = vrot.lane.b32.xlu1 %v2455_v26, %s2792_s5  ;;  %1057 = vrot.lane.b32.xlu0 %v2439_v30, %s2792_s5  ;;  %v2441_v26 = vld [vmem:[%s2879_s6 + $0xca] sm:$0xff] }
 0x1dd   : > { %v1206_v53 = vpop.permute.xlu1 %1205  ;;  %v1174_v50 = vpop.permute.xlu0 %1173 }
 0x1de   : > { %v1700_v22 = vsel %vm1676_vm5, %v1667_v63, %v1206_v53  ;;  %v1684_v25 = vsel %vm1676_vm5, %v1651_v44, %v1174_v50  ;;  %v2395_v50 = vld [vmem:[%s2879_s6 + $0x1a0] sm:$0xff] }
 0x1df   : > { %1215 = vrot.lane.b32.xlu1 %v2392_v8, %s2793_s21  ;;  %1183 = vrot.lane.b32.xlu0 %v2376_v56, %s2793_s21  ;;  %v2378_v8 = vld [vmem:[%s2879_s6 + $0xd8] sm:$0xff] }
 0x1e1   : > { %v1332_v54 = vpop.permute.xlu1 %1331  ;;  %v1300_v39 = vpop.permute.xlu0 %1299 }
 0x1e2   : > { %v1732_v14 = vsel %vm1709_vm6, %v1699_v31, %v1332_v54  ;;  %v1716_v9 = vsel %vm1709_vm6, %v1683_v43, %v1300_v39  ;;  %v2426_v39 = vld [vmem:[%s2879_s6 + $0x199] sm:$0xff] }
 0x1e3   : > { %1217 = vrot.lane.b32.xlu1 %v2393_v13, %s2793_s21  ;;  %1185 = vrot.lane.b32.xlu0 %v2377_v48, %s2793_s21  ;;  %v2379_v13 = vld [vmem:[%s2879_s6 + $0xe0] sm:$0xff] }
 0x1e5   : > { %v4048_v3 = vpop.permute.xlu1 %951  ;;  %v4050_v59 = vpop.permute.xlu0 %919 }
 0x1e6   : > { %v1635_v57 = vsel %vm1610_vm3, %v3690_v11, %v4048_v3  ;;  %v1619_v31 = vsel %vm1610_vm3, %v3602_v36, %v4050_v59  ;;  %v2442_v11 = vld [vmem:[%s2879_s6 + $0xda] sm:$0xff] }
 0x1e7   : > { %1343 = vrot.lane.b32.xlu1 %v2424_v12, %s2794_s12  ;;  %1311 = vrot.lane.b32.xlu0 %v2408_v19, %s2794_s12 }
 0x1e9   : > { %v1334_v37 = vpop.permute.xlu1 %1333  ;;  %v1302_v20 = vpop.permute.xlu0 %1301 }
 0x1ea   : > { %v1733_v7 = vsel %vm1709_vm6, %v1700_v22, %v1334_v37  ;;  %v1717_v29 = vsel %vm1709_vm6, %v1684_v25, %v1302_v20  ;;  %v2427_v20 = vld [vmem:[%s2879_s6 + $0x1a1] sm:$0xff] }
 0x1eb   : > { %963 = vrot.lane.b32.xlu1 %v2424_v12, %s2791_s10  ;;  %931 = vrot.lane.b32.xlu0 %v2408_v19, %s2791_s10  ;;  %v2410_v12 = vld [vmem:[%s2879_s6 + $0xd9] sm:$0xff] }
 0x1ed   : > { %v1460_v55 = vpop.permute.xlu1 %1459  ;;  %v1428_v41 = vpop.permute.xlu0 %1427 }
 0x1ee   : > { %v1765_v49 = vsel %vm1742_vm7, %v1732_v14, %v1460_v55  ;;  %v1749_v6 = vsel %vm1742_vm7, %v1716_v9, %v1428_v41  ;;  %v2458_v9 = vld [vmem:[%s2879_s6 + $0x19a] sm:$0xff] }
 0x1ef   : > { %1345 = vrot.lane.b32.xlu1 %v2425_v5, %s2794_s12  ;;  %1313 = vrot.lane.b32.xlu0 %v2409_v1, %s2794_s12 }
 0x1f0   : > { %2588 = vmatprep.mubr.msk.f32.mxu0 %vm1775_vm8, %v1749_v6  ;;  %2612 = vmatprep.mubr.msk.f32.mxu1 %vm1775_vm8, %v1765_v49  ;;  %v2459_v6 = vld [vmem:[%s2879_s6 + $0x1a2] sm:$0xff] }
 0x1f1   : > { %v4078_v42 = vpop.permute.xlu1 %953  ;;  %v4080_v38 = vpop.permute.xlu0 %921 }
 0x1f2   : > { %v1636_v61 = vsel %vm1610_vm3, %v3686_v4, %v4078_v42  ;;  %v1620_v63 = vsel %vm1610_vm3, %v3598_v16, %v4080_v38 }
 0x1f3   : > { %1471 = vrot.lane.b32.xlu1 %v2456_v17, %s2795_s23  ;;  %1439 = vrot.lane.b32.xlu0 %v2440_v35, %s2795_s23 }
 0x1f5   : > { %v1080_v33 = vpop.permute.xlu1 %1079  ;;  %v1048_v47 = vpop.permute.xlu0 %1047 }
 0x1f6   : > { %v1668_v43 = vsel %vm1643_vm4, %v1635_v57, %v1080_v33 }
 0x1f7   : > { %965 = vrot.lane.b32.xlu1 %v2425_v5, %s2791_s10  ;;  %933 = vrot.lane.b32.xlu0 %v2409_v1, %s2791_s10  ;;  %v1652_v5 = vsel %vm1643_vm4, %v1619_v31, %v1048_v47  ;;  %s189_s10 = sand.u32 1, %s2778_s18  }
 0x1f8   : > { %s2266_s24 = sshll.u32 %s189_s10, 8  ;;  %s4405_s11 = scalar_lea.sflag [#allocation4], %s189_s10 }
 0x1f9   : > { %v1462_v34 = vpop.permute.xlu1 %1461  ;;  %v1430_v60 = vpop.permute.xlu0 %1429  ;;  %s4227_s28 = scalar_lea.vmem [#allocation3], %s2266_s24 }
 0x1fa   : > { %v1766_v58 = vsel %vm1742_vm7, %v1733_v7, %v1462_v34  ;;  %v1750_v40 = vsel %vm1742_vm7, %v1717_v29, %v1430_v60  ;;  %s2200_s30 = sshll.u32 %s4227_s28, 4  ;;  %s4397_s30 = int_to_ptr.vmem [resolvable:$true] %s2200_s30 }
 0x1fb   : > { %1091 = vrot.lane.b32.xlu1 %v2456_v17, %s2792_s5  ;;  %1059 = vrot.lane.b32.xlu0 %v2440_v35, %s2792_s5  ;;  %v2443_v17 = vld [vmem:[%s2879_s6 + $0xe2] sm:$0xff]  ;;  %s2056_s6 = sld [smem:[#allocation2]]  ;;  %p2731_p0 = scmp.lt.s32.totalorder %s4397_s30, %s2729_s14 }
 0x1fc   : > { %2589 = vmatmul.mubr.msk.f32.gmra.mrb[6].mxu0 %vm1775_vm8, %v1750_v40  ;;  %2613 = vmatmul.mubr.msk.f32.gmra.mrb[6].mxu1 %vm1775_vm8, %v1766_v58 }
 0x1fd   : > { %v1082_v30 = vpop.permute.xlu1 %1081  ;;  %v1050_v10 = vpop.permute.xlu0 %1049 }
 0x1fe   : > { %v1669_v44 = vsel %vm1643_vm4, %v1636_v61, %v1082_v30  ;;  %v1653_v22 = vsel %vm1643_vm4, %v1620_v63, %v1050_v10 }
 0x1ff   : > { %1473 = vrot.lane.b32.xlu1 %v2457_v27, %s2795_s23  ;;  %1441 = vrot.lane.b32.xlu0 %v2441_v26, %s2795_s23 }
 0x201   : > { %v1208_v18 = vpop.permute.xlu1 %1207  ;;  %v1176_v2 = vpop.permute.xlu0 %1175 }
 0x202   : > { %v1701_v1 = vsel %vm1676_vm5, %v1668_v43, %v1208_v18  ;;  %v1685_v14 = vsel %vm1676_vm5, %v1652_v5, %v1176_v2 }
 0x203   : > { %1093 = vrot.lane.b32.xlu1 %v2457_v27, %s2792_s5  ;;  %1061 = vrot.lane.b32.xlu0 %v2441_v26, %s2792_s5 }
 0x205   : > { %v1210_v56 = vpop.permute.xlu1 %1209  ;;  %v1178_v53 = vpop.permute.xlu0 %1177 }
 0x206   : > { %v1702_v25 = vsel %vm1676_vm5, %v1669_v44, %v1210_v56  ;;  %v1686_v7 = vsel %vm1676_vm5, %v1653_v22, %v1178_v53 }
 0x207   : > { %1219 = vrot.lane.b32.xlu1 %v2394_v32, %s2793_s21  ;;  %1187 = vrot.lane.b32.xlu0 %v2378_v8, %s2793_s21 }
 0x209   : > { %v1336_v48 = vpop.permute.xlu1 %1335  ;;  %v1304_v54 = vpop.permute.xlu0 %1303 }
 0x20a   : > { %v1734_v3 = vsel %vm1709_vm6, %v1701_v1, %v1336_v48  ;;  %v1718_v36 = vsel %vm1709_vm6, %v1685_v14, %v1304_v54 }
 0x20b   : > { %1221 = vrot.lane.b32.xlu1 %v2395_v50, %s2793_s21  ;;  %1189 = vrot.lane.b32.xlu0 %v2379_v13, %s2793_s21 }
 0x20d   : > { %v4120_v19 = vpop.permute.xlu1 %955  ;;  %v4122_v37 = vpop.permute.xlu0 %923 }
 0x20e   : > { %v1637_v53 = vsel %vm1610_vm3, %v3702_v51, %v4120_v19  ;;  %v1621_v50 = vsel %vm1610_vm3, %v3614_v0, %v4122_v37 }
 0x20f   : > { %1347 = vrot.lane.b32.xlu1 %v2426_v39, %s2794_s12  ;;  %1315 = vrot.lane.b32.xlu0 %v2410_v12, %s2794_s12 }
 0x211   : > { %v1338_v15 = vpop.permute.xlu1 %1337  ;;  %v1306_v21 = vpop.permute.xlu0 %1305 }
 0x212   : > { %v1735_v29 = vsel %vm1709_vm6, %v1702_v25, %v1338_v15  ;;  %v1719_v34 = vsel %vm1709_vm6, %v1686_v7, %v1306_v21 }
 0x213   : > { %1349 = vrot.lane.b32.xlu1 %v2427_v20, %s2794_s12  ;;  %1317 = vrot.lane.b32.xlu0 %v2411_v23, %s2794_s12  ;;  %s2724_s12 = scalar_lea.vmem %s4397_s30, 4096 }
 0x214   : > { %p2725_p11 = scmp.ne.s32.totalorder %s4397_s30, %s2724_s12  ;;  %p2732_p1 = scmp.lt.s32.totalorder %s2730_s15, %s2724_s12 }
 0x215   : > { %v1464_v59 = vpop.permute.xlu1 %1463  ;;  %v1432_v55 = vpop.permute.xlu0 %1431 }
 0x216   : > { %v1767_v41 = vsel %vm1742_vm7, %v1734_v3, %v1464_v59  ;;  %v1751_v49 = vsel %vm1742_vm7, %v1718_v36, %v1432_v55  ;;  %p2726_p12 = pnand %p2725_p11, %p2864_p5  ;;  %p2733_p2 = por %p2732_p1, %p2731_p0 }
 0x217   : > { %1475 = vrot.lane.b32.xlu1 %v2458_v9, %s2795_s23  ;;  %1443 = vrot.lane.b32.xlu0 %v2442_v11, %s2795_s23 }
 0x218   : > { %2591 = vmatprep.mubr.msk.f32.mxu0 %vm1775_vm8, %v1751_v49  ;;  %2615 = vmatprep.mubr.msk.f32.mxu1 %vm1775_vm8, %v1767_v41  ;;  %p2727_p13 = pneg %p2726_p12 }
 0x219   : > { %v958_v35 = vpop.permute.xlu1 %957  ;;  %v926_v33 = vpop.permute.xlu0 %925 }
 0x21a   : > { %v1638_v31 = vsel %vm1610_vm3, %v3698_v46, %v958_v35  ;;  %v1622_v43 = vsel %vm1610_vm3, %v3610_v62, %v926_v33  ;;  %v4216_v33 = vld [vmem:[%s4449_s2] ss:$0 sm:$0xff]  ;;  %p2734_p3 = pnand %p2733_p2, %p2727_p13 }
 0x21b   : > { %1477 = vrot.lane.b32.xlu1 %v2459_v6, %s2795_s23  ;;  %1445 = vrot.lane.b32.xlu0 %v2443_v17, %s2795_s23 }
 0x21d   : > { %v1084_v47 = vpop.permute.xlu1 %1083  ;;  %v1052_v24 = vpop.permute.xlu0 %1051 }
 0x21e   : > { %v1670_v13 = vsel %vm1643_vm4, %v1637_v53, %v1084_v47  ;;  %v1654_v48 = vsel %vm1643_vm4, %v1621_v50, %v1052_v24  ;;  %v4220_v24 = vstv %s2056_s6 }
 0x221   : > { %v1466_v60 = vpop.permute.xlu1 %1465  ;;  %v1434_v58 = vpop.permute.xlu0 %1433 }
 0x222   : > { %v1768_v4 = vsel %vm1742_vm7, %v1735_v29, %v1466_v60  ;;  %v1752_v42 = vsel %vm1742_vm7, %v1719_v34, %v1434_v58 }
 0x223   : > { %2592 = vmatmul.mubr.msk.f32.gmra.mrb[8].mxu0 %vm1775_vm8, %v1752_v42  ;;  %2616 = vmatmul.mubr.msk.f32.gmra.mrb[8].mxu1 %vm1775_vm8, %v1768_v4 }
 0x225   : > { %v1086_v16 = vpop.permute.xlu1 %1085  ;;  %v1054_v38 = vpop.permute.xlu0 %1053 }
 0x226   : > { %v1671_v5 = vsel %vm1643_vm4, %v1638_v31, %v1086_v16  ;;  %v1655_v1 = vsel %vm1643_vm4, %v1622_v43, %v1054_v38 }
 0x229   : > { %v1212_v40 = vpop.permute.xlu1 %1211  ;;  %v1180_v27 = vpop.permute.xlu0 %1179 }
 0x22a   : > { %v1703_v54 = vsel %vm1676_vm5, %v1670_v13, %v1212_v40  ;;  %v1687_v39 = vsel %vm1676_vm5, %v1654_v48, %v1180_v27 }
 0x22d   : > { %v1214_v26 = vpop.permute.xlu1 %1213  ;;  %v1182_v30 = vpop.permute.xlu0 %1181 }
 0x22e   : > { %v1704_v14 = vsel %vm1676_vm5, %v1671_v5, %v1214_v26  ;;  %v1688_v9 = vsel %vm1676_vm5, %v1655_v1, %v1182_v30 }
 0x231   : > { %v1340_v10 = vpop.permute.xlu1 %1339  ;;  %v1308_v18 = vpop.permute.xlu0 %1307 }
 0x232   : > { %v1736_v12 = vsel %vm1709_vm6, %v1703_v54, %v1340_v10  ;;  %v1720_v20 = vsel %vm1709_vm6, %v1687_v39, %v1308_v18 }
 0x235   : > { %v4170_v2 = vpop.permute.xlu1 %959  ;;  %v4172_v32 = vpop.permute.xlu0 %927 }
 0x236   : > { %v1623_v53 = vsel %vm1610_vm3, %v3626_v52, %v4172_v32 }
 0x239   : > { %v1342_v8 = vpop.permute.xlu1 %1341  ;;  %v1310_v56 = vpop.permute.xlu0 %1309 }
 0x23a   : > { %v1737_v11 = vsel %vm1709_vm6, %v1704_v14, %v1342_v8  ;;  %v1721_v3 = vsel %vm1709_vm6, %v1688_v9, %v1310_v56  ;;  %v1639_v56 = vsel %vm1610_vm3, %v3715_v28, %v4170_v2 }
 0x23d   : > { %v1468_v23 = vpop.permute.xlu1 %1467  ;;  %v1436_v15 = vpop.permute.xlu0 %1435 }
 0x23e   : > { %v1769_v51 = vsel %vm1742_vm7, %v1736_v12, %v1468_v23  ;;  %v1753_v19 = vsel %vm1742_vm7, %v1720_v20, %v1436_v15 }
 0x23f   : > { %2594 = vmatprep.mubr.msk.f32.mxu0 %vm1775_vm8, %v1753_v19  ;;  %2618 = vmatprep.mubr.msk.f32.mxu1 %vm1775_vm8, %v1769_v51 }
 0x241   : > { %v4190_v0 = vpop.permute.xlu1 %961  ;;  %v4192_v37 = vpop.permute.xlu0 %929 }
 0x242   : > { %v1640_v19 = vsel %vm1610_vm3, %v3711_v45, %v4190_v0 }
 0x245   : > { %v1088_v21 = vpop.permute.xlu1 %1087  ;;  %v1056_v57 = vpop.permute.xlu0 %1055 }
 0x246   : > { %v1672_v50 = vsel %vm1643_vm4, %v1639_v56, %v1088_v21  ;;  %v1656_v13 = vsel %vm1643_vm4, %v1623_v53, %v1056_v57  ;;  %v4572_v21 = vld [vmem:[#allocation40_spill] sm:$0xff] }
 0x247   : > { %v1624_v57 = vsel %vm1610_vm3, %v4572_v21, %v4192_v37 }
 0x249   : > { %v1470_v36 = vpop.permute.xlu1 %1469  ;;  %v1438_v59 = vpop.permute.xlu0 %1437 }
 0x24a   : > { %v1770_v46 = vsel %vm1742_vm7, %v1737_v11, %v1470_v36  ;;  %v1754_v62 = vsel %vm1742_vm7, %v1721_v3, %v1438_v59 }
 0x24b   : > { %2595 = vmatmul.mubr.msk.f32.gmra.mrb[10].mxu0 %vm1775_vm8, %v1754_v62  ;;  %2619 = vmatmul.mubr.msk.f32.gmra.mrb[10].mxu1 %vm1775_vm8, %v1770_v46 }
 0x24d   : > { %v4208_v55 = vpop.permute.xlu1 %1089  ;;  %v4210_v41 = vpop.permute.xlu0 %1057 }
 0x24e   : > { %v1673_v31 = vsel %vm1643_vm4, %v1640_v19, %v4208_v55  ;;  %v1657_v43 = vsel %vm1643_vm4, %v1624_v57, %v4210_v41 }
 0x251   : > { %v1216_v49 = vpop.permute.xlu1 %1215  ;;  %v1184_v6 = vpop.permute.xlu0 %1183 }
 0x252   : > { %v1705_v48 = vsel %vm1676_vm5, %v1672_v50, %v1216_v49  ;;  %v1689_v54 = vsel %vm1676_vm5, %v1656_v13, %v1184_v6 }
 0x255   : > { %v1218_v17 = vpop.permute.xlu1 %1217  ;;  %v1186_v35 = vpop.permute.xlu0 %1185 }
 0x256   : > { %v1706_v5 = vsel %vm1676_vm5, %v1673_v31, %v1218_v17  ;;  %v1690_v1 = vsel %vm1676_vm5, %v1657_v43, %v1186_v35 }
 0x257   : > { %v2581_v47 = vpop.f32.mrb[0].mxu0 }
 0x258   : > { %v1903_v61 = vadd.f32 %v2581_v47, %v4216_v33  ;;  %v1897_v63 = vpop.f32.mrb[1].mxu0 }
 0x259   : > { %v1898_v44 = vadd.f32 %v4216_v33, %v1897_v63  ;;  %v1344_v22 = vpop.permute.xlu1 %1343  ;;  %v1312_v25 = vpop.permute.xlu0 %1311 }
 0x25a   : > { %vm2058_vm9 = vcmp.ge.f32.partialorder %v1903_v61, 0.0  ;;  %v2091_v7 = vmul.f32 %v4220_v24, %v1903_v61  ;;  %v1738_v39 = vsel %vm1709_vm6, %v1705_v48, %v1344_v22  ;;  %v1722_v12 = vsel %vm1709_vm6, %v1689_v54, %v1312_v25 }
 0x25b   : > { %vm2057_vm10 = vcmp.ge.f32.partialorder %v1898_v44, 0.0  ;;  %v2090_v29 = vmul.f32 %v4220_v24, %v1898_v44  ;;  %v2605_v34 = vpop.f32.mrb[0].mxu1 }
 0x25c   : > { %v2123_v60 = vsel %vm2058_vm9, %v1903_v61, %v2091_v7  ;;  %v1983_v58 = vadd.f32 %v2605_v34, %v4216_v33  ;;  %v1977_v4 = vpop.f32.mrb[1].mxu1 }
 0x25d   : > { %2155 = vst [vmem:[%s4227_s28 + $0x8] sm:$0xff] %v2123_v60  ;;  %v2122_v42 = vsel %vm2057_vm10, %v1898_v44, %v2090_v29  ;;  %v1978_v16 = vadd.f32 %v4216_v33, %v1977_v4  ;;  %v4231_v38 = vpop.permute.xlu1 %963  ;;  %v4233_v40 = vpop.permute.xlu0 %931 }
 0x25e   : > { %2154 = vst [vmem:[%s4227_s28] sm:$0xff] %v2122_v42  ;;  %vm2074_vm11 = vcmp.ge.f32.partialorder %v1983_v58, 0.0  ;;  %v2107_v27 = vmul.f32 %v4220_v24, %v1983_v58 }
 0x25f   : > { %vm2073_vm12 = vcmp.ge.f32.partialorder %v1978_v16, 0.0  ;;  %v2106_v26 = vmul.f32 %v4220_v24, %v1978_v16 }
 0x260   : > { %v2139_v30 = vsel %vm2074_vm11, %v1983_v58, %v2107_v27 }
 0x261   : > { %2171 = vst [vmem:[%s4227_s28 + $0x88] sm:$0xff] %v2139_v30  ;;  %v2138_v10 = vsel %vm2073_vm12, %v1978_v16, %v2106_v26  ;;  %v1346_v18 = vpop.permute.xlu1 %1345  ;;  %v1314_v8 = vpop.permute.xlu0 %1313  ;;  %v4573_v26 = vld [vmem:[#allocation17_spill] sm:$0xff] }
 0x262   : > { %2170 = vst [vmem:[%s4227_s28 + $0x80] sm:$0xff] %v2138_v10  ;;  %v1739_v14 = vsel %vm1709_vm6, %v1706_v5, %v1346_v18  ;;  %v1723_v9 = vsel %vm1709_vm6, %v1690_v1, %v1314_v8  ;;  %v1641_v30 = vsel %vm1610_vm3, %v4573_v26, %v4231_v38  ;;  %v4574_v10 = vld [vmem:[#allocation37_spill] sm:$0xff] }
 0x263   : > { %v1625_v18 = vsel %vm1610_vm3, %v4574_v10, %v4233_v40 }
 0x265   : > { %v1472_v20 = vpop.permute.xlu1 %1471  ;;  %v1440_v23 = vpop.permute.xlu0 %1439 }
 0x266   : > { %v1771_v28 = vsel %vm1742_vm7, %v1738_v39, %v1472_v20  ;;  %v1755_v2 = vsel %vm1742_vm7, %v1722_v12, %v1440_v23  ;;  %v4575_v39 = vld [vmem:[#allocation12_spill] sm:$0xff] }
 0x267   : > { %2597 = vmatprep.mubr.msk.f32.mxu0 %vm1775_vm8, %v1755_v2  ;;  %2621 = vmatprep.mubr.msk.f32.mxu1 %vm1775_vm8, %v1771_v28  ;;  %v4576_v12 = vld [vmem:[#allocation36_spill] sm:$0xff] }
 0x269   : > { %v4256_v52 = vpop.permute.xlu1 %965  ;;  %v4258_v32 = vpop.permute.xlu0 %933 }
 0x26a   : > { %v1642_v40 = vsel %vm1610_vm3, %v4575_v39, %v4256_v52  ;;  %v1626_v20 = vsel %vm1610_vm3, %v4576_v12, %v4258_v32 }
 0x26d   : > { %v1092_v15 = vpop.permute.xlu1 %1091  ;;  %v1060_v51 = vpop.permute.xlu0 %1059 }
 0x26e   : > { %v1674_v8 = vsel %vm1643_vm4, %v1641_v30, %v1092_v15  ;;  %v1658_v56 = vsel %vm1643_vm4, %v1625_v18, %v1060_v51 }
 0x271   : > { %v1474_v11 = vpop.permute.xlu1 %1473  ;;  %v1442_v45 = vpop.permute.xlu0 %1441 }
 0x272   : > { %v1772_v0 = vsel %vm1742_vm7, %v1739_v14, %v1474_v11  ;;  %v1756_v37 = vsel %vm1742_vm7, %v1723_v9, %v1442_v45 }
 0x273   : > { %2598 = vmatmul.mubr.msk.f32.gmra.mrb[12].mxu0 %vm1775_vm8, %v1756_v37  ;;  %2622 = vmatmul.mubr.msk.f32.gmra.mrb[12].mxu1 %vm1775_vm8, %v1772_v0 }
 0x275   : > { %v1094_v3 = vpop.permute.xlu1 %1093  ;;  %v1062_v36 = vpop.permute.xlu0 %1061 }
 0x276   : > { %v1675_v2 = vsel %vm1643_vm4, %v1642_v40, %v1094_v3  ;;  %v1659_v15 = vsel %vm1643_vm4, %v1626_v20, %v1062_v36 }
 0x279   : > { %v1220_v59 = vpop.permute.xlu1 %1219  ;;  %v1188_v46 = vpop.permute.xlu0 %1187 }
 0x27a   : > { %v1707_v53 = vsel %vm1676_vm5, %v1674_v8, %v1220_v59  ;;  %v1691_v50 = vsel %vm1676_vm5, %v1658_v56, %v1188_v46 }
 0x27d   : > { %v1222_v62 = vpop.permute.xlu1 %1221  ;;  %v1190_v55 = vpop.permute.xlu0 %1189 }
 0x27e   : > { %v1708_v51 = vsel %vm1676_vm5, %v1675_v2, %v1222_v62  ;;  %v1692_v52 = vsel %vm1676_vm5, %v1659_v15, %v1190_v55 }
 0x27f   : > { %v2584_v41 = vpop.f32.mrb[2].mxu0  ;;  %v2608_v49 = vpop.f32.mrb[2].mxu1 }
 0x280   : > { %v1913_v6 = vadd.f32 %v2584_v41, %v4216_v33  ;;  %v1993_v17 = vadd.f32 %v2608_v49, %v4216_v33  ;;  %v1907_v35 = vpop.f32.mrb[3].mxu0  ;;  %v1987_v47 = vpop.f32.mrb[3].mxu1 }
 0x281   : > { %v1908_v61 = vadd.f32 %v4216_v33, %v1907_v35  ;;  %v1988_v63 = vadd.f32 %v4216_v33, %v1987_v47  ;;  %v1348_v44 = vpop.permute.xlu1 %1347  ;;  %v1316_v22 = vpop.permute.xlu0 %1315 }
 0x282   : > { %vm2060_vm13 = vcmp.ge.f32.partialorder %v1913_v6, 0.0  ;;  %v2093_v25 = vmul.f32 %v4220_v24, %v1913_v6  ;;  %vm2076_vm14 = vcmp.ge.f32.partialorder %v1993_v17, 0.0  ;;  %v2109_v7 = vmul.f32 %v4220_v24, %v1993_v17 }
 0x283   : > { %vm2059_vm15 = vcmp.ge.f32.partialorder %v1908_v61, 0.0  ;;  %v2092_v29 = vmul.f32 %v4220_v24, %v1908_v61  ;;  %vm2075_vm0 = vcmp.ge.f32.partialorder %v1988_v63, 0.0  ;;  %v2108_v34 = vmul.f32 %v4220_v24, %v1988_v63 }
 0x284   : > { %v2125_v60 = vsel %vm2060_vm13, %v1913_v6, %v2093_v25  ;;  %v2141_v58 = vsel %vm2076_vm14, %v1993_v17, %v2109_v7  ;;  %v1740_v13 = vsel %vm1709_vm6, %v1707_v53, %v1348_v44  ;;  %v1724_v48 = vsel %vm1709_vm6, %v1691_v50, %v1316_v22 }
 0x285   : > { %2157 = vst [vmem:[%s4227_s28 + $0x18] sm:$0xff] %v2125_v60  ;;  %2173 = vst [vmem:[%s4227_s28 + $0x98] sm:$0xff] %v2141_v58  ;;  %v2124_v4 = vsel %vm2059_vm15, %v1908_v61, %v2092_v29  ;;  %v2140_v42 = vsel %vm2075_vm0, %v1988_v63, %v2108_v34  ;;  %v1350_v16 = vpop.permute.xlu1 %1349  ;;  %v1318_v27 = vpop.permute.xlu0 %1317 }
 0x286   : > { %2156 = vst [vmem:[%s4227_s28 + $0x10] sm:$0xff] %v2124_v4  ;;  %2172 = vst [vmem:[%s4227_s28 + $0x90] sm:$0xff] %v2140_v42  ;;  %v1741_v19 = vsel %vm1709_vm6, %v1708_v51, %v1350_v16  ;;  %v1725_v32 = vsel %vm1709_vm6, %v1692_v52, %v1318_v27 }
 0x289   : > { %v1476_v54 = vpop.permute.xlu1 %1475  ;;  %v1444_v38 = vpop.permute.xlu0 %1443 }
 0x28a   : > { %v1773_v23 = vsel %vm1742_vm7, %v1740_v13, %v1476_v54  ;;  %v1757_v28 = vsel %vm1742_vm7, %v1724_v48, %v1444_v38 }
 0x28b   : > { %2600 = vmatprep.mubr.msk.f32.mxu0 %vm1775_vm8, %v1757_v28  ;;  %2624 = vmatprep.mubr.msk.f32.mxu1 %vm1775_vm8, %v1773_v23 }
 0x28d   : > { %v1478_v21 = vpop.permute.xlu1 %1477  ;;  %v1446_v57 = vpop.permute.xlu0 %1445 }
 0x28e   : > { %v1774_v31 = vsel %vm1742_vm7, %v1741_v19, %v1478_v21  ;;  %v1758_v43 = vsel %vm1742_vm7, %v1725_v32, %v1446_v57 }
 0x28f   : > { %2601 = vmatmul.mubr.msk.f32.gmra.mrb[14].mxu0 %vm1775_vm8, %v1758_v43  ;;  %2625 = vmatmul.mubr.msk.f32.gmra.mrb[14].mxu1 %vm1775_vm8, %v1774_v31 }
 0x2a7   : > { %v2587_v5 = vpop.f32.mrb[4].mxu0  ;;  %v2611_v1 = vpop.f32.mrb[4].mxu1 }
 0x2a8   : > { %v1923_v14 = vadd.f32 %v2587_v5, %v4216_v33  ;;  %v2003_v9 = vadd.f32 %v2611_v1, %v4216_v33  ;;  %v1917_v11 = vpop.f32.mrb[5].mxu0  ;;  %v1997_v45 = vpop.f32.mrb[5].mxu1 }
 0x2a9   : > { %v1918_v0 = vadd.f32 %v4216_v33, %v1917_v11  ;;  %v1998_v37 = vadd.f32 %v4216_v33, %v1997_v45 }
 0x2aa   : > { %vm2062_vm1 = vcmp.ge.f32.partialorder %v1923_v14, 0.0  ;;  %v2095_v3 = vmul.f32 %v4220_v24, %v1923_v14  ;;  %vm2078_vm2 = vcmp.ge.f32.partialorder %v2003_v9, 0.0  ;;  %v2111_v36 = vmul.f32 %v4220_v24, %v2003_v9 }
 0x2ab   : > { %vm2061_vm3 = vcmp.ge.f32.partialorder %v1918_v0, 0.0  ;;  %v2094_v59 = vmul.f32 %v4220_v24, %v1918_v0  ;;  %vm2077_vm4 = vcmp.ge.f32.partialorder %v1998_v37, 0.0  ;;  %v2110_v46 = vmul.f32 %v4220_v24, %v1998_v37 }
 0x2ac   : > { %v2127_v62 = vsel %vm2062_vm1, %v1923_v14, %v2095_v3  ;;  %v2143_v55 = vsel %vm2078_vm2, %v2003_v9, %v2111_v36 }
 0x2ad   : > { %2159 = vst [vmem:[%s4227_s28 + $0x28] sm:$0xff] %v2127_v62  ;;  %2175 = vst [vmem:[%s4227_s28 + $0xa8] sm:$0xff] %v2143_v55  ;;  %v2126_v41 = vsel %vm2061_vm3, %v1918_v0, %v2094_v59  ;;  %v2142_v49 = vsel %vm2077_vm4, %v1998_v37, %v2110_v46 }
 0x2ae   : > { %2158 = vst [vmem:[%s4227_s28 + $0x20] sm:$0xff] %v2126_v41  ;;  %2174 = vst [vmem:[%s4227_s28 + $0xa0] sm:$0xff] %v2142_v49 }
 0x2cf   : > { %v2590_v6 = vpop.f32.mrb[6].mxu0  ;;  %v2614_v17 = vpop.f32.mrb[6].mxu1 }
 0x2d0   : > { %v1933_v35 = vadd.f32 %v2590_v6, %v4216_v33  ;;  %v2013_v47 = vadd.f32 %v2614_v17, %v4216_v33  ;;  %v1927_v61 = vpop.f32.mrb[7].mxu0  ;;  %v2007_v63 = vpop.f32.mrb[7].mxu1 }
 0x2d1   : > { %v1928_v44 = vadd.f32 %v4216_v33, %v1927_v61  ;;  %v2008_v22 = vadd.f32 %v4216_v33, %v2007_v63 }
 0x2d2   : > { %vm2064_vm5 = vcmp.ge.f32.partialorder %v1933_v35, 0.0  ;;  %v2097_v25 = vmul.f32 %v4220_v24, %v1933_v35  ;;  %vm2080_vm6 = vcmp.ge.f32.partialorder %v2013_v47, 0.0  ;;  %v2113_v7 = vmul.f32 %v4220_v24, %v2013_v47 }
 0x2d3   : > { %vm2063_vm7 = vcmp.ge.f32.partialorder %v1928_v44, 0.0  ;;  %v2096_v29 = vmul.f32 %v4220_v24, %v1928_v44  ;;  %vm2079_vm8 = vcmp.ge.f32.partialorder %v2008_v22, 0.0  ;;  %v2112_v34 = vmul.f32 %v4220_v24, %v2008_v22 }
 0x2d4   : > { %v2129_v60 = vsel %vm2064_vm5, %v1933_v35, %v2097_v25  ;;  %v2145_v58 = vsel %vm2080_vm6, %v2013_v47, %v2113_v7 }
 0x2d5   : > { %2161 = vst [vmem:[%s4227_s28 + $0x38] sm:$0xff] %v2129_v60  ;;  %2177 = vst [vmem:[%s4227_s28 + $0xb8] sm:$0xff] %v2145_v58  ;;  %v2128_v4 = vsel %vm2063_vm7, %v1928_v44, %v2096_v29  ;;  %v2144_v42 = vsel %vm2079_vm8, %v2008_v22, %v2112_v34 }
 0x2d6   : > { %2160 = vst [vmem:[%s4227_s28 + $0x30] sm:$0xff] %v2128_v4  ;;  %2176 = vst [vmem:[%s4227_s28 + $0xb0] sm:$0xff] %v2144_v42 }
 0x2f6   : > { %v2593_v16 = vpop.f32.mrb[8].mxu0  ;;  %v2617_v27 = vpop.f32.mrb[8].mxu1 }
 0x2f7   : > { %v1943_v26 = vadd.f32 %v2593_v16, %v4216_v33  ;;  %v2023_v30 = vadd.f32 %v2617_v27, %v4216_v33  ;;  %v1937_v10 = vpop.f32.mrb[9].mxu0  ;;  %v2017_v18 = vpop.f32.mrb[9].mxu1 }
 0x2f8   : > { %v1938_v8 = vadd.f32 %v4216_v33, %v1937_v10  ;;  %v2018_v56 = vadd.f32 %v4216_v33, %v2017_v18 }
 0x2f9   : > { %vm2066_vm9 = vcmp.ge.f32.partialorder %v1943_v26, 0.0  ;;  %v2099_v53 = vmul.f32 %v4220_v24, %v1943_v26  ;;  %vm2082_vm10 = vcmp.ge.f32.partialorder %v2023_v30, 0.0  ;;  %v2115_v50 = vmul.f32 %v4220_v24, %v2023_v30 }
 0x2fa   : > { %vm2065_vm11 = vcmp.ge.f32.partialorder %v1938_v8, 0.0  ;;  %v2098_v13 = vmul.f32 %v4220_v24, %v1938_v8  ;;  %vm2081_vm12 = vcmp.ge.f32.partialorder %v2018_v56, 0.0  ;;  %v2114_v48 = vmul.f32 %v4220_v24, %v2018_v56 }
 0x2fb   : > { %v2131_v54 = vsel %vm2066_vm9, %v1943_v26, %v2099_v53  ;;  %v2147_v38 = vsel %vm2082_vm10, %v2023_v30, %v2115_v50 }
 0x2fc   : > { %2163 = vst [vmem:[%s4227_s28 + $0x48] sm:$0xff] %v2131_v54  ;;  %2179 = vst [vmem:[%s4227_s28 + $0xc8] sm:$0xff] %v2147_v38  ;;  %v2130_v39 = vsel %vm2065_vm11, %v1938_v8, %v2098_v13  ;;  %v2146_v40 = vsel %vm2081_vm12, %v2018_v56, %v2114_v48 }
 0x2fd   : > { %2162 = vst [vmem:[%s4227_s28 + $0x40] sm:$0xff] %v2130_v39  ;;  %2178 = vst [vmem:[%s4227_s28 + $0xc0] sm:$0xff] %v2146_v40 }
 0x31e   : > { %v2596_v12 = vpop.f32.mrb[10].mxu0  ;;  %v2620_v20 = vpop.f32.mrb[10].mxu1 }
 0x31f   : > { %v1953_v23 = vadd.f32 %v2596_v12, %v4216_v33  ;;  %v2033_v28 = vadd.f32 %v2620_v20, %v4216_v33  ;;  %v1947_v2 = vpop.f32.mrb[11].mxu0  ;;  %v2027_v15 = vpop.f32.mrb[11].mxu1 }
 0x320   : > { %v1948_v51 = vadd.f32 %v4216_v33, %v1947_v2  ;;  %v2028_v52 = vadd.f32 %v4216_v33, %v2027_v15 }
 0x321   : > { %vm2068_vm13 = vcmp.ge.f32.partialorder %v1953_v23, 0.0  ;;  %v2101_v19 = vmul.f32 %v4220_v24, %v1953_v23  ;;  %vm2084_vm14 = vcmp.ge.f32.partialorder %v2033_v28, 0.0  ;;  %v2117_v32 = vmul.f32 %v4220_v24, %v2033_v28 }
 0x322   : > { %vm2067_vm15 = vcmp.ge.f32.partialorder %v1948_v51, 0.0  ;;  %v2100_v21 = vmul.f32 %v4220_v24, %v1948_v51  ;;  %vm2083_vm0 = vcmp.ge.f32.partialorder %v2028_v52, 0.0  ;;  %v2116_v57 = vmul.f32 %v4220_v24, %v2028_v52 }
 0x323   : > { %v2133_v31 = vsel %vm2068_vm13, %v1953_v23, %v2101_v19  ;;  %v2149_v43 = vsel %vm2084_vm14, %v2033_v28, %v2117_v32 }
 0x324   : > { %2165 = vst [vmem:[%s4227_s28 + $0x58] sm:$0xff] %v2133_v31  ;;  %2181 = vst [vmem:[%s4227_s28 + $0xd8] sm:$0xff] %v2149_v43  ;;  %v2132_v5 = vsel %vm2067_vm15, %v1948_v51, %v2100_v21  ;;  %v2148_v1 = vsel %vm2083_vm0, %v2028_v52, %v2116_v57 }
 0x325   : > { %2164 = vst [vmem:[%s4227_s28 + $0x50] sm:$0xff] %v2132_v5  ;;  %2180 = vst [vmem:[%s4227_s28 + $0xd0] sm:$0xff] %v2148_v1 }
 0x346   : > { %v2599_v14 = vpop.f32.mrb[12].mxu0  ;;  %v2623_v9 = vpop.f32.mrb[12].mxu1 }
 0x347   : > { %v1963_v11 = vadd.f32 %v2599_v14, %v4216_v33  ;;  %v2043_v45 = vadd.f32 %v2623_v9, %v4216_v33  ;;  %v1957_v0 = vpop.f32.mrb[13].mxu0  ;;  %v2037_v37 = vpop.f32.mrb[13].mxu1 }
 0x348   : > { %v1958_v3 = vadd.f32 %v4216_v33, %v1957_v0  ;;  %v2038_v36 = vadd.f32 %v4216_v33, %v2037_v37 }
 0x349   : > { %vm2070_vm1 = vcmp.ge.f32.partialorder %v1963_v11, 0.0  ;;  %v2103_v59 = vmul.f32 %v4220_v24, %v1963_v11  ;;  %vm2086_vm2 = vcmp.ge.f32.partialorder %v2043_v45, 0.0  ;;  %v2119_v46 = vmul.f32 %v4220_v24, %v2043_v45 }
 0x34a   : > { %vm2069_vm3 = vcmp.ge.f32.partialorder %v1958_v3, 0.0  ;;  %v2102_v62 = vmul.f32 %v4220_v24, %v1958_v3  ;;  %vm2085_vm4 = vcmp.ge.f32.partialorder %v2038_v36, 0.0  ;;  %v2118_v55 = vmul.f32 %v4220_v24, %v2038_v36 }
 0x34b   : > { %v2135_v41 = vsel %vm2070_vm1, %v1963_v11, %v2103_v59  ;;  %v2151_v49 = vsel %vm2086_vm2, %v2043_v45, %v2119_v46 }
 0x34c   : > { %2167 = vst [vmem:[%s4227_s28 + $0x68] sm:$0xff] %v2135_v41  ;;  %2183 = vst [vmem:[%s4227_s28 + $0xe8] sm:$0xff] %v2151_v49  ;;  %v2134_v6 = vsel %vm2069_vm3, %v1958_v3, %v2102_v62  ;;  %v2150_v17 = vsel %vm2085_vm4, %v2038_v36, %v2118_v55 }
 0x34d   : > { %2166 = vst [vmem:[%s4227_s28 + $0x60] sm:$0xff] %v2134_v6  ;;  %2182 = vst [vmem:[%s4227_s28 + $0xe0] sm:$0xff] %v2150_v17 }
 0x362   : > { %v2602_v35 = vpop.f32.mrb[14].mxu0  ;;  %v2626_v47 = vpop.f32.mrb[14].mxu1 }
 0x363   : > { %v1973_v61 = vadd.f32 %v2602_v35, %v4216_v33  ;;  %v2053_v63 = vadd.f32 %v2626_v47, %v4216_v33  ;;  %v1967_v44 = vpop.f32.mrb[15].mxu0  ;;  %v2047_v22 = vpop.f32.mrb[15].mxu1 }
 0x364   : > { %v1968_v25 = vadd.f32 %v4216_v33, %v1967_v44  ;;  %v2048_v7 = vadd.f32 %v4216_v33, %v2047_v22 }
 0x365   : > { %vm2072_vm5 = vcmp.ge.f32.partialorder %v1973_v61, 0.0  ;;  %v2105_v29 = vmul.f32 %v4220_v24, %v1973_v61  ;;  %vm2088_vm6 = vcmp.ge.f32.partialorder %v2053_v63, 0.0  ;;  %v2121_v34 = vmul.f32 %v4220_v24, %v2053_v63 }
 0x366   : > { %vm2071_vm7 = vcmp.ge.f32.partialorder %v1968_v25, 0.0  ;;  %v2104_v60 = vmul.f32 %v4220_v24, %v1968_v25  ;;  %vm2087_vm8 = vcmp.ge.f32.partialorder %v2048_v7, 0.0  ;;  %v2120_v58 = vmul.f32 %v4220_v24, %v2048_v7 }
 0x367   : > { %v2137_v33 = vsel %vm2072_vm5, %v1973_v61, %v2105_v29  ;;  %v2153_v4 = vsel %vm2088_vm6, %v2053_v63, %v2121_v34 }
 0x368   : > { %2169 = vst [vmem:[%s4227_s28 + $0x78] sm:$0xff] %v2137_v33  ;;  %2185 = vst [vmem:[%s4227_s28 + $0xf8] sm:$0xff] %v2153_v4  ;;  %v2136_v42 = vsel %vm2071_vm7, %v1968_v25, %v2104_v60  ;;  %v2152_v16 = vsel %vm2087_vm8, %v2048_v7, %v2120_v58 }
 0x369   : > { %2168 = vst [vmem:[%s4227_s28 + $0x70] sm:$0xff] %v2136_v42  ;;  %2184 = vst [vmem:[%s4227_s28 + $0xf0] sm:$0xff] %v2152_v16 }
 0x36a   : > { %2737 = shalt.err (!%p2734_p3)
}
 0x36b   : > { %s2738_s16 = scalar_lea.hbm %s4395_s9, 4096  ;;  %s2742_s10 = scalar_lea.hbm %s4451_s4, 8192 }
 0x36c   : > { %p2739_p4 = scmp.ne.s32.totalorder %s4395_s9, %s2738_s16  ;;  %p2743_p9 = scmp.lt.u32.totalorder %s4395_s9, %s4451_s4 }
 0x36d   : > { %p2744_p10 = scmp.lt.u32.totalorder %s2742_s10, %s2738_s16  ;;  %p2746_p12 = scmp.lt.u32.totalorder %s2738_s16, %s4395_s9 }
 0x36e   : > { %p2740_p7 = pnand %p2739_p4, %p2864_p5 }
 0x36f   : > { %p2745_p11 = por %p2744_p10, %p2743_p9 }
 0x370   : > { %p2741_p8 = pneg %p2740_p7 }
 0x371   : > { %p2747_p13 = por %p2746_p12, %p2745_p11 }
 0x373   : > { %p2748_p0 = pnand %p2747_p13, %p2741_p8 }
 0x375   : > { %2751 = shalt.err (!%p2748_p0)
}
 0x376   : > { %s2797_s24 = smov 128  }
 0x377   : > { %2676 = dma.vmem_to_hbm [thread:$0]  (%p2864_p5), %s4397_s30, 4096, %s4395_s9, %s4405_s11, %s2797_s24, %s2797_s24, %s2788_s7  }
 0x378 PF: > { %p2682_p1 = scmp.ge.s32.totalorder %s2786_s20, 2  ;;  %s2215_s28 = sand.u32 1, %s2774_s17  }
 0x379   : > { %s2216_s29 = scalar_lea.sflag [#allocation4], %s2215_s28 }
 0x37a   : > { %p2679_p2 = pnand %p2682_p1, %p2868_p6 }
 0x37c   : > { %2769 = dma.done.wait (!%p2679_p2), %s2216_s29, 4096  }
 0x37d   : > { %2771 = vsyncadd (!%p2679_p2), %s2216_s29, 4294963200  ;;  %p15_p3 = scmp.ge.s32.totalorder %s2851_s22, 4   ;;  %s4577_s17 = smov %s2778_s18 }
 0x37e   : > { %s4578_s18 = smov %s2782_s19  ;;  %s4579_s19 = smov %s2862_s25 }
 0x37f   : > { %s4580_s20 = smov %s2851_s22  ;;  %17 = sbr.rel (!%p15_p3) target bundleno = 5 (0x5), region = 73 }
 0x386   :  { %2221 = vsyncpa [#allocation4], 1 }
 0x387   :  { %2223 = vsyncpa [#allocation4 + $0x1], 1 }

</bundles_post_ra>
